<compile_context>
chip_gen: v6e
topology: v6e:2x2x1
jax: 0.10.0
libtpu: 0.0.40
codegen_flags: <defaults>
</compile_context>

<pallas_src>
import functools

import jax
import jax.numpy as jnp
import numpy as np
from jax.experimental import pallas as pl
from jax.experimental.pallas import tpu as pltpu


def sub_attention_kernel(spf_ref, w_ref, mmul_ref, madd_ref, bo_ref, o_ref, *, head_dim):
    # spf_ref : (dim, n)          superpixel features, superpixels on lanes
    # w_ref   : (2*hd + dim, dim) fused weight [W_q h0; W_k h0; W_o @ W_v]
    # mmul_ref: (n, n) bf16       mask multiplier  {0, 1}
    # madd_ref: (n, n) bf16       mask addend      {0, -9e15, 1.0 (diag)}
    # bo_ref  : (dim, 1)          to_out bias
    # o_ref   : (dim, n)          output = to_out(attn @ v)^T
    x_t = spf_ref[...]                                   # (dim, n)
    dim = x_t.shape[0]
    scale = dim ** -0.5                                  # temperature uses full dim (as in module)

    # One fused projection matmul: (2*hd + dim, dim) @ (dim, n)
    proj = jnp.dot(w_ref[...], x_t, preferred_element_type=jnp.float32)
    q0 = proj[0:head_dim, :]                             # (hd, n)   q, head 0
    k0 = proj[head_dim:2 * head_dim, :]                  # (hd, n)   k, head 0
    yv_t = proj[2 * head_dim:, :]                        # (dim, n)  = W_o @ W_v @ x^T

    # Per-superpixel L2 normalization over head_dim (axis 0).  rsqrt goes to the EUP slot;
    # the attention temperature is folded into q's 1-vreg normalizer instead of scaling
    # the full (n, n) score tile.
    qss = jnp.sum(q0 * q0, axis=0, keepdims=True)        # (1, n)
    kss = jnp.sum(k0 * k0, axis=0, keepdims=True)        # (1, n)
    q0 = q0 * (jax.lax.rsqrt(jnp.maximum(qss, 1e-24)) * scale)
    k0 = k0 * jax.lax.rsqrt(jnp.maximum(kss, 1e-24))

    # s[i, j] = scaled(q_i . k_j)   (TN dot, contract head_dim)  -> (n, n)
    s = jax.lax.dot_general(q0, k0, (((0,), (0,)), ((), ())),
                            preferred_element_type=jnp.float32)

    # Adjacency mask + forced diagonal folded into one multiply/add pair (host precomputed).
    s = s * mmul_ref[...].astype(jnp.float32) + madd_ref[...].astype(jnp.float32)

    # Row max is exactly 1.0: the diagonal is forced to 1 and every other unmasked score
    # has magnitude <= scale < 1 (unit q, k); masked scores are -9e15.
    e = jnp.exp(s - 1.0)

    # Softmax normalization via reciprocal-multiply (reciprocal on EUP, cheap vmul).
    denom = jnp.sum(e, axis=-1, keepdims=True)           # (n, 1)
    p = e * pl.reciprocal(denom, approx=False)

    # y^T = (W_o W_v x^T) P^T + b_o    (output projection already folded into yv_t; valid
    # because the single head-0 attention matrix multiplies every head's V).  NT dot.
    y_t = jax.lax.dot_general(yv_t, p, (((1,), (1,)), ((), ())),
                              preferred_element_type=jnp.float32) + bo_ref[...]
    o_ref[...] = y_t.astype(o_ref.dtype)


def fold_weights(wqkv, wo, *, num_heads):
    """One-time host-side folding: keep only the q/k head-0 rows of W_qkv and fold the
    output projection into the value projection (W_o @ W_v). Returns (2*hd + dim, dim)."""
    dim = wo.shape[0]
    hd = dim // num_heads
    wq0 = wqkv[0:hd, :]
    wk0 = wqkv[dim:dim + hd, :]
    wyv = wo @ wqkv[2 * dim:3 * dim, :]
    return jnp.concatenate([wq0, wk0, wyv], axis=0)


def fold_mask(adjacency):
    """One-time host-side mask folding into a multiply/add pair (bf16).
    mul = 1 on connected off-diagonal, else 0.
    add = 1.0 on the diagonal, -9e15 on unconnected off-diagonal, else 0."""
    adjacency = np.asarray(adjacency)
    n = adjacency.shape[0]
    eye = np.eye(n, dtype=bool)
    connected = adjacency > 0
    mmul = np.where(connected & ~eye, 1.0, 0.0).astype(np.float32)
    madd = np.where(eye, 1.0, np.where(connected, 0.0, -9e15)).astype(np.float32)
    return (jnp.asarray(mmul, dtype=jnp.bfloat16),
            jnp.asarray(madd, dtype=jnp.bfloat16))


def sub_attention(spf, w_fused, mmul, madd, bo, *, num_heads):
    """spf: (dim, n); w_fused: (2*hd + dim, dim); mmul/madd: (n, n) bf16; bo: (dim,).
    Returns (dim, n) == out[0].t() that the module hands to ops['map_sp2p']."""
    dim, n = spf.shape
    hd = dim // num_heads
    assert w_fused.shape == (2 * hd + dim, dim)
    bo2 = bo.reshape(dim, 1)

    kernel = functools.partial(sub_attention_kernel, head_dim=hd)
    vmem = pl.BlockSpec(memory_space=pltpu.MemorySpace.VMEM)
    return pl.pallas_call(
        kernel,
        out_shape=jax.ShapeDtypeStruct((dim, n), spf.dtype),
        in_specs=[vmem, vmem, vmem, vmem, vmem],
        out_specs=vmem,
    )(spf, w_fused, mmul, madd, bo2)


def get_A(segments_map, n_spixels):
    """Host-side reproduction of sub_Attention.get_A (numpy loop over 2x2 windows).
    Returns a single (n, n) adjacency; the module replicates it over heads but only
    head 0 is ever used."""
    A = np.zeros([n_spixels, n_spixels], dtype=np.float32)
    h, w = segments_map.shape
    for i in range(h - 2):
        for j in range(w - 2):
            sub = segments_map[i:i + 2, j:j + 2]
            sub_max = int(np.max(sub))
            sub_min = int(np.min(sub))
            if sub_max != sub_min:
                if A[sub_max, sub_min] != 0:
                    continue
                A[sub_max, sub_min] = A[sub_min, sub_max] = 1
    np.fill_diagonal(A, 0)
    return A


def reference(spf, adjacency, wqkv, wo, bo, *, num_heads):
    """Pure-JAX re-implementation of the torch forward (attention core), unfused weights."""
    dim, n = spf.shape
    hd = dim // num_heads
    x = spf.T[None, :, :]                                     # (1, n, dim)
    qkv = jnp.matmul(x, wqkv.T)                               # (1, n, 3*dim)
    q, k, v = jnp.split(qkv, 3, axis=-1)

    def to_heads(t):
        return t.reshape(1, n, num_heads, hd).transpose(0, 2, 1, 3)

    q, k, v = to_heads(q), to_heads(k), to_heads(v)
    q = q / jnp.maximum(jnp.linalg.norm(q, axis=-1, keepdims=True), 1e-12)
    k = k / jnp.maximum(jnp.linalg.norm(k, axis=-1, keepdims=True), 1e-12)
    attn = jnp.matmul(q, jnp.swapaxes(k, -1, -2)) * (dim ** -0.5)    # (1, h, n, n)
    mask4d = jnp.broadcast_to(adjacency[None, None], (1, num_heads, n, n))
    attn = jnp.where(mask4d > 0, attn, jnp.float32(-9e15))
    a00 = attn[0, 0]
    a00 = jnp.where(jnp.eye(n, dtype=bool), jnp.float32(1.0), a00)
    p = jax.nn.softmax(a00[None, None, :, :], axis=-1)               # (1, 1, n, n)
    out = jnp.matmul(p, v)                                           # broadcast over heads
    out = out.transpose(0, 2, 1, 3).reshape(1, n, dim)
    out = jnp.matmul(out, wo.T) + bo
    return out[0].T                                                  # (dim, n)


if __name__ == "__main__":
    jax.config.update("jax_default_matmul_precision", "highest")

    # Module config: sub_Attention(h=16, w=16, scale=2, dim=32, num_heads=4)
    h, w, scale_cfg, dim, num_heads = 16, 16, 2, 32, 4
    n_spixels = int(h * w / scale_cfg)          # 128 superpixels

    # TODO(synk): SP_assign (Pixel2SP) produces the segments map and the superpixel
    # features spf; stand in with a deterministic segments map and random features.
    segments_map = (np.arange(h * w).reshape(h, w) // scale_cfg).astype(np.int32)
    adjacency_np = get_A(segments_map, n_spixels)

    key = jax.random.PRNGKey(0)
    kf, kq, ko, kb = jax.random.split(key, 4)
    spf = jax.random.normal(kf, (dim, n_spixels), dtype=jnp.float32)       # spf[0]: '(b c) m'
    wqkv = jax.random.normal(kq, (3 * dim, dim), dtype=jnp.float32) / np.sqrt(dim)
    wo = jax.random.normal(ko, (dim, dim), dtype=jnp.float32) / np.sqrt(dim)
    bo = jax.random.normal(kb, (dim,), dtype=jnp.float32) * 0.02

    # One-time host-side folding (init-time cost, not per-call).
    w_fused = fold_weights(wqkv, wo, num_heads=num_heads)                  # (48, 32)
    mmul, madd = fold_mask(adjacency_np)                                   # (128, 128) bf16 x2

    out = sub_attention(spf, w_fused, mmul, madd, bo, num_heads=num_heads)
    out = jax.block_until_ready(out)

    ref = reference(spf, jnp.asarray(adjacency_np), wqkv, wo, bo, num_heads=num_heads)
    assert out.shape == (dim, n_spixels)
    max_err = float(jnp.max(jnp.abs(out - ref)))
    assert jnp.allclose(out, ref, atol=1e-4, rtol=1e-4), f"max abs err = {max_err}"
    print("KERNEL_OK")
</pallas_src>

<mosaic_0001>
module attributes {stable_mosaic.version = 11 : i64} {
  func.func @sub_attention_kernel(%arg0: memref<32x128xf32, #tpu.memory_space<vmem>>, %arg1: memref<48x32xf32, #tpu.memory_space<vmem>>, %arg2: memref<128x128xbf16, #tpu.memory_space<vmem>>, %arg3: memref<128x128xbf16, #tpu.memory_space<vmem>>, %arg4: memref<32x1xf32, #tpu.memory_space<vmem>>, %arg5: memref<32x128xf32, #tpu.memory_space<vmem>>) attributes {dimension_semantics = [], scalar_prefetch = 0 : i64, scratch_operands = 0 : i64, tpu.core_type = #tpu.core_type<tc>} {
    %c0 = arith.constant 0 : index
    %c0_0 = arith.constant 0 : index
    %0 = vector.load %arg0[%c0, %c0_0] : memref<32x128xf32, #tpu.memory_space<vmem>>, vector<32x128xf32>
    %c0_1 = arith.constant 0 : index
    %c0_2 = arith.constant 0 : index
    %1 = vector.load %arg1[%c0_1, %c0_2] : memref<48x32xf32, #tpu.memory_space<vmem>>, vector<48x32xf32>
    %cst = arith.constant dense<0.000000e+00> : vector<48x128xf32>
    %2 = tpu.matmul %1, %0, %cst {dimension_numbers = #tpu.dot_dimension_numbers<[1], [0], [0], [1], [0, 0, 1, 1], [], []>, precision = #tpu.contract_precision<fp32>} : vector<48x32xf32>, vector<32x128xf32>, vector<48x128xf32> -> vector<48x128xf32>
    %3 = vector.extract_strided_slice %2 {offsets = [0, 0], sizes = [8, 128], strides = [1, 1]} : vector<48x128xf32> to vector<8x128xf32>
    %4 = vector.extract_strided_slice %2 {offsets = [8, 0], sizes = [8, 128], strides = [1, 1]} : vector<48x128xf32> to vector<8x128xf32>
    %5 = vector.extract_strided_slice %2 {offsets = [16, 0], sizes = [32, 128], strides = [1, 1]} : vector<48x128xf32> to vector<32x128xf32>
    %6 = arith.mulf %3, %3 : vector<8x128xf32>
    %cst_3 = arith.constant dense<0.000000e+00> : vector<128xf32>
    %7 = vector.multi_reduction <add>, %6, %cst_3 [0] : vector<8x128xf32> to vector<128xf32>
    %8 = vector.shape_cast %7 : vector<128xf32> to vector<1x128xf32>
    %9 = arith.mulf %4, %4 : vector<8x128xf32>
    %cst_4 = arith.constant dense<0.000000e+00> : vector<128xf32>
    %10 = vector.multi_reduction <add>, %9, %cst_4 [0] : vector<8x128xf32> to vector<128xf32>
    %11 = vector.shape_cast %10 : vector<128xf32> to vector<1x128xf32>
    %cst_5 = arith.constant 1.000000e-24 : f32
    %12 = vector.broadcast %cst_5 : f32 to vector<1x128xf32>
    %13 = arith.maximumf %8, %12 : vector<1x128xf32>
    %14 = math.rsqrt %13 : vector<1x128xf32>
    %cst_6 = arith.constant 0.176776692 : f32
    %15 = vector.broadcast %cst_6 : f32 to vector<1x128xf32>
    %16 = arith.mulf %14, %15 : vector<1x128xf32>
    %17 = vector.broadcast %16 : vector<1x128xf32> to vector<8x128xf32>
    %18 = arith.mulf %3, %17 : vector<8x128xf32>
    %cst_7 = arith.constant 1.000000e-24 : f32
    %19 = vector.broadcast %cst_7 : f32 to vector<1x128xf32>
    %20 = arith.maximumf %11, %19 : vector<1x128xf32>
    %21 = math.rsqrt %20 : vector<1x128xf32>
    %22 = vector.broadcast %21 : vector<1x128xf32> to vector<8x128xf32>
    %23 = arith.mulf %4, %22 : vector<8x128xf32>
    %cst_8 = arith.constant dense<0.000000e+00> : vector<128x128xf32>
    %24 = tpu.matmul %18, %23, %cst_8 {dimension_numbers = #tpu.dot_dimension_numbers<[0], [0], [1], [1], [0, 1, 1, 1], [], []>, precision = #tpu.contract_precision<fp32>} : vector<8x128xf32>, vector<8x128xf32>, vector<128x128xf32> -> vector<128x128xf32>
    %c0_9 = arith.constant 0 : index
    %c0_10 = arith.constant 0 : index
    %25 = vector.load %arg2[%c0_9, %c0_10] : memref<128x128xbf16, #tpu.memory_space<vmem>>, vector<128x128xbf16>
    %26 = arith.extf %25 : vector<128x128xbf16> to vector<128x128xf32>
    %27 = arith.mulf %24, %26 : vector<128x128xf32>
    %c0_11 = arith.constant 0 : index
    %c0_12 = arith.constant 0 : index
    %28 = vector.load %arg3[%c0_11, %c0_12] : memref<128x128xbf16, #tpu.memory_space<vmem>>, vector<128x128xbf16>
    %29 = arith.extf %28 : vector<128x128xbf16> to vector<128x128xf32>
    %30 = arith.addf %27, %29 : vector<128x128xf32>
    %cst_13 = arith.constant 1.000000e+00 : f32
    %31 = vector.broadcast %cst_13 : f32 to vector<128x128xf32>
    %32 = arith.subf %30, %31 : vector<128x128xf32>
    %33 = math.exp %32 : vector<128x128xf32>
    %cst_14 = arith.constant dense<0.000000e+00> : vector<128xf32>
    %34 = vector.multi_reduction <add>, %33, %cst_14 [1] : vector<128x128xf32> to vector<128xf32>
    %35 = vector.shape_cast %34 : vector<128xf32> to vector<128x1xf32>
    %36 = tpu.reciprocal %35 : vector<128x1xf32> -> vector<128x1xf32>
    %37 = vector.broadcast %36 : vector<128x1xf32> to vector<128x128xf32>
    %38 = arith.mulf %33, %37 : vector<128x128xf32>
    %cst_15 = arith.constant dense<0.000000e+00> : vector<32x128xf32>
    %39 = tpu.matmul %5, %38, %cst_15 {dimension_numbers = #tpu.dot_dimension_numbers<[1], [1], [0], [0], [0, 0, 1, 0], [], []>, precision = #tpu.contract_precision<fp32>} : vector<32x128xf32>, vector<128x128xf32>, vector<32x128xf32> -> vector<32x128xf32>
    %c0_16 = arith.constant 0 : index
    %c0_17 = arith.constant 0 : index
    %40 = vector.load %arg4[%c0_16, %c0_17] : memref<32x1xf32, #tpu.memory_space<vmem>>, vector<32x1xf32>
    %41 = vector.broadcast %40 : vector<32x1xf32> to vector<32x128xf32>
    %42 = arith.addf %39, %41 : vector<32x128xf32>
    %c0_18 = arith.constant 0 : index
    %c0_19 = arith.constant 0 : index
    %43 = vector.load %arg5[%c0_18, %c0_19] : memref<32x128xf32, #tpu.memory_space<vmem>>, vector<32x128xf32>
    tpu.vector_store %arg5[%c0_18, %c0_19], %42 {strides = array<i32>} : memref<32x128xf32, #tpu.memory_space<vmem>>, vector<32x128xf32>,
    return
  }
}

</mosaic_0001>

<bundles_post_ra>
// kernel: tpu_custom_call.1
= control target key start
LH: loop header
LB: loop body
LE: loop exit
PB: predicated region body
PF: predicated region fallthrough
CT: control target
= control target key end

     0   :  { %10 = vsyncpa [#allocation3], 0  ;;  %s5043_s0 = inlined_call_operand.vmem [shape: f32[32,128], index: 0, kind: input, shape index: {}]   ;;  %s5044_s1 = inlined_call_operand.vmem [shape: f32[48,32], index: 1, kind: input, shape index: {}]   ;;  %s5045_s2 = inlined_call_operand.vmem [shape: bf16[128,128], index: 2, kind: input, shape index: {}]   ;;  %s5046_s3 = inlined_call_operand.hbm [shape: bf16[128,128], index: 3, kind: input, shape index: {}]   ;;  %s5047_s4 = inlined_call_operand.vmem [shape: f32[32,1], index: 4, kind: input, shape index: {}]   ;;  %s5048_s5 = inlined_call_operand.hbm [shape: f32[32,128], index: 5, kind: output, shape index: {}]  }
   0x1   :  { %11 = vsyncpa [#allocation4], 0  ;;  %s3964_s18 = smov [#allocation2]  }
   0x2   :  { %s23_s19 = sshll.u32 %s3964_s18, 4  ;;  %s24_s19 = int_to_ptr.vmem [resolvable:$true] %s23_s19 }
   0x3   :  { %s3928_s20 = scalar_lea.vmem %s24_s19, 1024  ;;  %p3933_p1 = scmp.lt.s32.totalorder %s24_s19, %s24_s19 }
   0x4   :  { %p3929_p0 = scmp.ne.s32.totalorder %s24_s19, %s3928_s20  ;;  %p3934_p2 = scmp.lt.s32.totalorder %s3928_s20, %s3928_s20 }
   0x6   :  { %p3935_p3 = por %p3934_p2, %p3933_p1 }
   0x8   :  { %p3936_p4 = pnand %p3935_p3, %p3929_p0 }
   0xa   :  { %3939 = shalt.err (!%p3936_p4)
}
   0xb   :  { %s3965_s21 = smov 64   ;;  %s3966_s22 = smov 4  }
   0xc   :  { %29 = dma.hbm_to_vmem [thread:$0]  %s5046_s3, 1024, %s24_s19, [#allocation3], %s3965_s21, %s3965_s21, %s3966_s22  }
   0xd   :  { %3960 = dma.done.wait [#allocation3], 1024  }
   0xe   :  { %3961 = vsyncadd [#allocation3], 4294966272  ;;  %vm45_vm0 = vcmask 261120   ;;  %v38_v0 = vld [vmem:[%s5043_s0 + $0x18] sm:$0xff]  ;;  %v37_v1 = vld [vmem:[%s5043_s0 + $0x10] sm:$0xff]  ;;  %vm817_vm1 = vcmask 64512  }
   0xf   :  { %v36_v2 = vld [vmem:[%s5043_s0 + $0x8] sm:$0xff]  ;;  %v4013_v3 = vand.u32 4294901760, %v38_v0  ;;  %v4015_v4 = vand.u32 4294901760, %v37_v1  ;;  %v35_v6 = vld [vmem:[%s5043_s0] sm:$0xff]  ;;  %v41_v12 = vld [vmem:[%s5044_s1 + $0x10] sm:$0xff] }
  0x10   :  { %v4017_v5 = vand.u32 4294901760, %v36_v2  ;;  %v39_v7 = vld [vmem:[%s5044_s1] sm:$0xff]  ;;  %v40_v8 = vld [vmem:[%s5044_s1 + $0x8] sm:$0xff]  ;;  %v4028_v9 = vand.u32 4294901760, %v35_v6  ;;  %v42_v13 = vld [vmem:[%s5044_s1 + $0x18] sm:$0xff]  ;;  %v53_v19 = vsel %vm45_vm0, %v41_v12, 0 }
  0x11   :  { %v47_v10 = vsel %vm45_vm0, %v39_v7, 0  ;;  %v50_v11 = vsel %vm45_vm0, %v40_v8, 0  ;;  %3356 = vmatprep.subr.mxu0 %v4013_v3  ;;  %v219_v14 = vsub.f32 %v38_v0, %v4013_v3  ;;  %v4045_v17 = vsub.f32 %v37_v1, %v4015_v4  ;;  %v43_v38 = vld [vmem:[%s5044_s1 + $0x20] sm:$0xff]  ;;  %v44_v39 = vld [vmem:[%s5044_s1 + $0x28] sm:$0xff] }
  0x12   :  { %v4040_v15 = vand.u32 4294901760, %v47_v10  ;;  %v4042_v16 = vand.u32 4294901760, %v50_v11  ;;  %3357 = vmatpush3.msra.mxu0 %v4013_v3  ;;  %v4049_v18 = vsub.f32 %v36_v2, %v4017_v5  ;;  %v56_v20 = vsel %vm45_vm0, %v42_v13, 0 }
  0x13   :  { %v4054_v21 = vsub.f32 %v35_v6, %v4028_v9  ;;  %3358 = vmatprep.subr.mxu0 %v4015_v4  ;;  %v4057_v22 = vand.u32 4294901760, %v219_v14  ;;  %v4066_v25 = vand.u32 4294901760, %v4045_v17  ;;  %v4073_v27 = vand.u32 4294901760, %v53_v19 }
  0x14   :  { %v4060_v23 = vsub.f32 %v47_v10, %v4040_v15  ;;  %v4063_v24 = vsub.f32 %v50_v11, %v4042_v16  ;;  %3381 = vmatprep.mubr.f32.mxu1 %v4040_v15  ;;  %3359 = vmatpush3.msra.mxu0 %v4015_v4  ;;  %v4071_v26 = vand.u32 4294901760, %v4049_v18  ;;  %v4075_v28 = vand.u32 4294901760, %v56_v20 }
  0x15   :  { %v4078_v29 = vand.u32 4294901760, %v4054_v21  ;;  %3360 = vmatprep.subr.mxu0 %v4017_v5  ;;  %v221_v30 = vsub.f32 %v219_v14, %v4057_v22  ;;  %v228_v33 = vsub.f32 %v4045_v17, %v4066_v25  ;;  %v4090_v35 = vsub.f32 %v53_v19, %v4073_v27 }
  0x16   :  { %v135_v31 = vand.u32 4294901760, %v4060_v23  ;;  %v145_v32 = vand.u32 4294901760, %v4063_v24  ;;  %3361 = vmatpush3.msra.mxu0 %v4017_v5  ;;  %v235_v34 = vsub.f32 %v4049_v18, %v4071_v26  ;;  %v4093_v36 = vsub.f32 %v56_v20, %v4075_v28 }
  0x17   :  { %v242_v37 = vsub.f32 %v4054_v21, %v4078_v29  ;;  %3362 = vmatprep.subr.mxu0 %v4028_v9  ;;  %v222_v40 = vand.u32 4294901760, %v221_v30  ;;  %v229_v43 = vand.u32 4294901760, %v228_v33  ;;  %v155_v45 = vand.u32 4294901760, %v4090_v35 }
  0x18   :  { %v136_v41 = vsub.f32 %v4060_v23, %v135_v31  ;;  %v146_v42 = vsub.f32 %v4063_v24, %v145_v32  ;;  %3363 = vmatpush3.msra.mxu0 %v4028_v9  ;;  %v236_v44 = vand.u32 4294901760, %v235_v34  ;;  %v165_v46 = vand.u32 4294901760, %v4093_v36 }
  0x19   :  { %3373 = vmatprep.subr.mxu1 %v222_v40  ;;  %3390 = vmatprep.subr.mxu0 %v219_v14  ;;  %v59_v49 = vsel %vm45_vm0, %v43_v38, 0  ;;  %v62_v50 = vsel %vm45_vm0, %v44_v39, 0  ;;  %v156_v51 = vsub.f32 %v4090_v35, %v155_v45  ;;  %v243_v55 = vand.u32 4294901760, %v242_v37 }
  0x1a   :  { %v137_v47 = vand.u32 4294901760, %v136_v41  ;;  %v147_v48 = vand.u32 4294901760, %v146_v42  ;;  %3374 = vmatpush3.msra.mxu1 %v222_v40  ;;  %v166_v52 = vsub.f32 %v4093_v36, %v165_v46  ;;  %v4121_v53 = vand.u32 4294901760, %v59_v49 }
  0x1b   :  { %v4123_v54 = vand.u32 4294901760, %v62_v50  ;;  %3375 = vmatprep.subr.mxu1 %v229_v43  ;;  %v157_v56 = vand.u32 4294901760, %v156_v51 }
  0x1c   :  { %3364 = vmatprep.mubr.f32.mxu0 %v137_v47  ;;  %3376 = vmatpush3.msra.mxu1 %v229_v43  ;;  %v167_v57 = vand.u32 4294901760, %v166_v52  ;;  %v174_v58 = vsub.f32 %v59_v49, %v4121_v53 }
  0x1d   :  { %3365 = vmatmul.mubr.f32.vlgmr.msra.gmra.mxu0 %v147_v48  ;;  %v4127_v59 = vsub.f32 %v62_v50, %v4123_v54  ;;  %3377 = vmatprep.subr.mxu1 %v236_v44 }
  0x1e   :  { %3391 = vmatpush3.msra.mxu0 %v219_v14  ;;  %3367 = vmatprep.mubr.f32.mxu0 %v157_v56  ;;  %v175_v60 = vand.u32 4294901760, %v174_v58 }
  0x1f   :  { %3378 = vmatpush3.msra.mxu1 %v236_v44  ;;  %v185_v61 = vand.u32 4294901760, %v4127_v59  ;;  %3392 = vmatprep.subr.mxu0 %v4045_v17 }
  0x20   :  { %3379 = vmatprep.subr.mxu1 %v243_v55  ;;  %v176_v62 = vsub.f32 %v174_v58, %v175_v60  ;;  %3393 = vmatpush3.msra.mxu0 %v4045_v17 }
  0x21   :  { %3368 = vmatmul.mubr.f32.gmra.mxu0 %v167_v57  ;;  %3380 = vmatpush3.msra.mxu1 %v243_v55  ;;  %v186_v63 = vsub.f32 %v4127_v59, %v185_v61 }
  0x22   :  { %3382 = vmatmul.mubr.f32.vlgmr.msra.gmra.mxu1 %v4042_v16  ;;  %3407 = vmatprep.subr.mxu1 %v4013_v3  ;;  %v177_v0 = vand.u32 4294901760, %v176_v62 }
  0x23   :  { %3408 = vmatpush3.msra.mxu1 %v4013_v3  ;;  %v187_v1 = vand.u32 4294901760, %v186_v63  ;;  %3394 = vmatprep.subr.mxu0 %v4049_v18 }
  0x24   :  { %3384 = vmatprep.mubr.f32.mxu1 %v4073_v27  ;;  %3370 = vmatprep.mubr.f32.mxu0 %v177_v0 }
  0x25   :  { %3395 = vmatpush3.msra.mxu0 %v4049_v18  ;;  %3409 = vmatprep.subr.mxu1 %v4015_v4 }
  0x26   :  { %3371 = vmatmul.mubr.f32.gmra.mxu0 %v187_v1  ;;  %3385 = vmatmul.mubr.f32.gmra.mxu1 %v4075_v28 }
  0x27   :  { %3396 = vmatprep.subr.mxu0 %v4054_v21  ;;  %3410 = vmatpush3.msra.mxu1 %v4015_v4 }
  0x28   :  { %3397 = vmatpush3.msra.mxu0 %v4054_v21  ;;  %3398 = vmatprep.mubr.f32.mxu0 %v4060_v23 }
  0x29   :  { %3411 = vmatprep.subr.mxu1 %v4017_v5  ;;  %3387 = vmatprep.mubr.f32.mxu1 %v4121_v53 }
  0x2a   :  { %3399 = vmatmul.mubr.f32.vlgmr.msra.gmra.mxu0 %v4063_v24  ;;  %3412 = vmatpush3.msra.mxu1 %v4017_v5 }
  0x2b   :  { %3401 = vmatprep.mubr.f32.mxu0 %v4090_v35  ;;  %3388 = vmatmul.mubr.f32.gmra.mxu1 %v4123_v54 }
  0x2c   :  { %3413 = vmatprep.subr.mxu1 %v4028_v9  ;;  %3424 = vmatprep.subr.mxu0 %v4057_v22 }
  0x2d   :  { %3414 = vmatpush3.msra.mxu1 %v4028_v9  ;;  %3415 = vmatprep.mubr.f32.mxu1 %v135_v31 }
  0x2e   :  { %3402 = vmatmul.mubr.f32.gmra.mxu0 %v4093_v36  ;;  %3441 = vmatprep.subr.mxu1 %v4013_v3 }
  0x2f   :  { %3425 = vmatpush3.msra.mxu0 %v4057_v22  ;;  %3416 = vmatmul.mubr.f32.vlgmr.msra.gmra.mxu1 %v145_v32 }
  0x30   :  { %3426 = vmatprep.subr.mxu0 %v4066_v25  ;;  %3404 = vmatprep.mubr.f32.mxu0 %v174_v58 }
  0x31   :  { %3427 = vmatpush3.msra.mxu0 %v4066_v25  ;;  %3442 = vmatpush3.msra.mxu1 %v4013_v3 }
  0x32   :  { %3405 = vmatmul.mubr.f32.gmra.mxu0 %v4127_v59  ;;  %3428 = vmatprep.subr.mxu0 %v4071_v26 }
  0x33   :  { %3418 = vmatprep.mubr.f32.mxu1 %v155_v45  ;;  %3429 = vmatpush3.msra.mxu0 %v4071_v26 }
  0x34   :  { %3443 = vmatprep.subr.mxu1 %v4015_v4  ;;  %3419 = vmatmul.mubr.f32.gmra.mxu1 %v165_v46 }
  0x35   :  { %3430 = vmatprep.subr.mxu0 %v4078_v29  ;;  %3444 = vmatpush3.msra.mxu1 %v4015_v4 }
  0x36   :  { %3431 = vmatpush3.msra.mxu0 %v4078_v29  ;;  %3432 = vmatprep.mubr.f32.mxu0 %v4040_v15 }
  0x37   :  { %3445 = vmatprep.subr.mxu1 %v4017_v5  ;;  %3433 = vmatmul.mubr.f32.vlgmr.msra.gmra.mxu0 %v4042_v16 }
  0x38   :  { %3421 = vmatprep.mubr.f32.mxu1 %v175_v60  ;;  %3446 = vmatpush3.msra.mxu1 %v4017_v5 }
  0x39   :  { %3435 = vmatprep.mubr.f32.mxu0 %v4073_v27  ;;  %3422 = vmatmul.mubr.f32.gmra.mxu1 %v185_v61 }
  0x3a   :  { %3447 = vmatprep.subr.mxu1 %v4028_v9  ;;  %3449 = vmatprep.mubr.f32.mxu1 %v4040_v15 }
  0x3b   :  { %3448 = vmatpush3.msra.mxu1 %v4028_v9  ;;  %3436 = vmatmul.mubr.f32.gmra.mxu0 %v4075_v28 }
  0x3c   :  { %3438 = vmatprep.mubr.f32.mxu0 %v4121_v53 }
  0x3d   :  { %3450 = vmatmul.mubr.f32.vlgmr.msra.gmra.mxu1 %v4042_v16 }
  0x3e   :  { %3452 = vmatprep.mubr.f32.mxu1 %v4073_v27 }
  0x3f   :  { %3439 = vmatmul.mubr.f32.gmra.mxu0 %v4123_v54 }
  0x41   :  { %3453 = vmatmul.mubr.f32.gmra.mxu1 %v4075_v28 }
  0x42   :  { %3455 = vmatprep.mubr.f32.mxu1 %v4121_v53 }
  0x45   :  { %3456 = vmatmul.mubr.f32.gmra.mxu1 %v4123_v54 }
  0xdd   :  { %v3366_v2 = vpop.f32.mrf.mxu0 }
  0xdf   :  { %v139_v3 = vpop.f32.mrf.mxu0 }
  0xe1   :  { %v3369_v4 = vpop.f32.mrf.mxu0 }
  0xe2   :  { %v3383_v5 = vpop.f32.mrf.mxu1 }
  0xe3   :  { %v159_v6 = vpop.f32.mrf.mxu0  ;;  %v287_v32 = vadd.f32 %v3383_v5, %v3366_v2 }
  0xe4   :  { %v280_v7 = vpop.f32.mrf.mxu1 }
  0xe5   :  { %v281_v36 = vadd.f32 %v280_v7, %v139_v3 }
  0xe6   :  { %v3372_v8 = vpop.f32.mrf.mxu0  ;;  %v3386_v9 = vpop.f32.mrf.mxu1 }
  0xe7   :  { %v299_v11 = vadd.f32 %v3386_v9, %v3369_v4 }
  0xe8   :  { %v179_v10 = vpop.f32.mrf.mxu0  ;;  %v292_v12 = vpop.f32.mrf.mxu1 }
  0xe9   :  { %v293_v13 = vadd.f32 %v292_v12, %v159_v6 }
  0xea   :  { %v3400_v14 = vpop.f32.mrf.mxu0 }
  0xeb   :  { %v3389_v15 = vpop.f32.mrf.mxu1  ;;  %v398_v37 = vadd.f32 %v3400_v14, %v287_v32 }
  0xec   :  { %v390_v16 = vpop.f32.mrf.mxu0  ;;  %v311_v17 = vadd.f32 %v3389_v15, %v3372_v8 }
  0xed   :  { %v304_v18 = vpop.f32.mrf.mxu1  ;;  %v391_v40 = vadd.f32 %v390_v16, %v281_v36 }
  0xee   :  { %v3403_v19 = vpop.f32.mrf.mxu0  ;;  %v305_v20 = vadd.f32 %v304_v18, %v179_v10 }
  0xef   :  { %v412_v21 = vadd.f32 %v3403_v19, %v299_v11  ;;  %v3417_v23 = vpop.f32.mrf.mxu1 }
  0xf0   :  { %v404_v22 = vpop.f32.mrf.mxu0  ;;  %v511_v41 = vadd.f32 %v3417_v23, %v398_v37 }
  0xf1   :  { %v405_v24 = vadd.f32 %v404_v22, %v293_v13  ;;  %v502_v26 = vpop.f32.mrf.mxu1 }
  0xf2   :  { %v3406_v25 = vpop.f32.mrf.mxu0  ;;  %v503_v45 = vadd.f32 %v502_v26, %v391_v40 }
  0xf3   :  { %v426_v27 = vadd.f32 %v3406_v25, %v311_v17 }
  0xf4   :  { %v418_v28 = vpop.f32.mrf.mxu0  ;;  %v3420_v30 = vpop.f32.mrf.mxu1 }
  0xf5   :  { %v419_v29 = vadd.f32 %v418_v28, %v305_v20  ;;  %v527_v31 = vadd.f32 %v3420_v30, %v412_v21 }
  0xf6   :  { %v518_v33 = vpop.f32.mrf.mxu1 }
  0xf7   :  { %v4191_v34 = vadd.f32 %v518_v33, %v405_v24  ;;  %v3434_v35 = vpop.f32.mrf.mxu0 }
  0xf8   :  { %v632_v46 = vadd.f32 %v3434_v35, %v511_v41 }
  0xf9   :  { %v3423_v38 = vpop.f32.mrf.mxu1  ;;  %v625_v39 = vpop.f32.mrf.mxu0 }
  0xfa   :  { %v543_v42 = vadd.f32 %v3423_v38, %v426_v27  ;;  %v626_v51 = vadd.f32 %v625_v39, %v503_v45 }
  0xfb   :  { %v534_v43 = vpop.f32.mrf.mxu1  ;;  %v3437_v44 = vpop.f32.mrf.mxu0 }
  0xfc   :  { %v4193_v47 = vadd.f32 %v534_v43, %v419_v29  ;;  %v644_v48 = vadd.f32 %v3437_v44, %v527_v31 }
  0xfd   :  { %v4195_v49 = vpop.f32.mrf.mxu0  ;;  %v3451_v50 = vpop.f32.mrf.mxu1 }
  0xfe   :  { %v737_v52 = vadd.f32 %v3451_v50, %v632_v46 }
  0xff   :  { %v3440_v53 = vpop.f32.mrf.mxu0  ;;  %v730_v54 = vpop.f32.mrf.mxu1 }
 0x100   :  { %v771_v55 = vmul.f32 %v737_v52, %v737_v52  ;;  %v656_v56 = vadd.f32 %v3440_v53, %v543_v42  ;;  %v731_v57 = vadd.f32 %v730_v54, %v626_v51 }
 0x101   :  { %v3454_v58 = vpop.f32.mrf.mxu1 }
 0x102   :  { %v772_v59 = vrot.slane %v771_v55, 4  ;;  %v764_v60 = vmul.f32 %v731_v57, %v731_v57  ;;  %v4197_v61 = vadd.f32 %v3454_v58, %v644_v48 }
 0x103   :  { %v4199_v62 = vpop.f32.mrf.mxu1 }
 0x104   :  { %5059 = vst [vmem:[#allocation8_spill] sm:$0xff] %v4197_v61  ;;  %v773_v63 = vadd.f32 %v772_v59, %v771_v55  ;;  %v765_v0 = vrot.slane %v764_v60, 4 }
 0x105   :  { %v3457_v1 = vpop.f32.mrf.mxu1 }
 0x106   :  { %v774_v2 = vrot.slane %v773_v63, 2  ;;  %v766_v3 = vadd.f32 %v765_v0, %v764_v60  ;;  %v4201_v4 = vadd.f32 %v3457_v1, %v656_v56 }
 0x108   :  { %5060 = vst [vmem:[#allocation9_spill] sm:$0xff] %v4201_v4  ;;  %v775_v5 = vadd.f32 %v774_v2, %v773_v63  ;;  %v767_v6 = vrot.slane %v766_v3, 2  ;;  %v3072_v4 = vld [vmem:[#allocation2 + $0x30] sm:$0xff]  }
 0x10a   :  { %v776_v7 = vrot.slane %v775_v5, 1  ;;  %v768_v8 = vadd.f32 %v767_v6, %v766_v3 }
 0x10c   :  { %v777_v9 = vadd.f32 %v776_v7, %v775_v5  ;;  %v769_v10 = vrot.slane %v768_v8, 1 }
 0x10e   :  { %v782_v11 = vmax.f32 %v777_v9, 1e-24  ;;  %v770_v12 = vadd.f32 %v769_v10, %v768_v8 }
 0x110   :  { %3852 = vrsqrt.f32 %v782_v11  ;;  %v778_v13 = vmax.f32 %v770_v12, 1e-24 }
 0x112   :  { %3854 = vrsqrt.f32 %v778_v13 }
 0x11d   :  { %v3853_v14 = vpop.eup %3852 }
 0x11e   :  { %v784_v15 = vmul.f32 %v3853_v14, %v737_v52 }
 0x11f   :  { %v3855_v16 = vpop.eup %3854 }
 0x120   :  { %v4203_v17 = vand.u32 4294901760, %v784_v15  ;;  %v780_v18 = vmul.f32 0.17677669, %v3855_v16 }
 0x122   :  { %v1124_v19 = vsub.f32 %v784_v15, %v4203_v17  ;;  %3458 = vmatprep.subr.mxu0 %v4203_v17  ;;  %v781_v20 = vmul.f32 %v780_v18, %v731_v57 }
 0x123   :  { %3459 = vmatpush3.msra.mxu0 %v4203_v17 }
 0x124   :  { %3510 = vmatprep.subr.mxu0 %v1124_v19  ;;  %785 = vxpose.xlu0.b32.start.end [1/1] (short) %v781_v20, 128  ;;  %v4208_v21 = vand.u32 4294901760, %v1124_v19 }
 0x126   :  { %v1126_v22 = vsub.f32 %v1124_v19, %v4208_v21 }
 0x128   :  { %v1127_v23 = vand.u32 4294901760, %v1126_v22 }
 0x12a   :  { %3484 = vmatprep.subr.mxu1 %v1127_v23 }
 0x12b   :  { %3485 = vmatpush3.msra.mxu1 %v1127_v23 }
 0x12c   :  { %3536 = vmatprep.subr.mxu1 %v4203_v17 }
 0x1a0   :  { %v801_v24 = vpop.trf.xlu0 }
 0x1a1   :  { %v819_v25 = vsel %vm817_vm1, %v801_v24, 0 }
 0x1a2   :  { %v4213_v26 = vand.u32 4294901760, %v819_v25 }
 0x1a4   :  { %v4216_v27 = vsub.f32 %v819_v25, %v4213_v26  ;;  %v802_v28 = vpop.trf.xlu0  ;;  %3486 = vmatprep.mubr.f32.mxu1 %v4213_v26 }
 0x1a5   :  { %v822_v29 = vsel %vm817_vm1, %v802_v28, 0 }
 0x1a6   :  { %v934_v30 = vand.u32 4294901760, %v4216_v27  ;;  %v4221_v31 = vand.u32 4294901760, %v822_v29 }
 0x1a8   :  { %v4224_v32 = vsub.f32 %v822_v29, %v4221_v31  ;;  %3487 = vmatmul.mubr.f32.vlgmr.msra.gmra.mxu1 %v4221_v31  ;;  %v803_v33 = vpop.trf.xlu0  ;;  %v935_v35 = vsub.f32 %v4216_v27, %v934_v30 }
 0x1a9   :  { %3537 = vmatpush3.msra.mxu1 %v4203_v17  ;;  %v825_v36 = vsel %vm817_vm1, %v803_v33, 0 }
 0x1aa   :  { %v944_v37 = vand.u32 4294901760, %v4224_v32  ;;  %v4233_v38 = vand.u32 4294901760, %v825_v36  ;;  %3588 = vmatprep.subr.mxu1 %v4203_v17  ;;  %v936_v39 = vand.u32 4294901760, %v935_v35 }
 0x1ac   :  { %v945_v40 = vsub.f32 %v4224_v32, %v944_v37  ;;  %v4240_v41 = vsub.f32 %v825_v36, %v4233_v38  ;;  %3460 = vmatprep.mubr.f32.mxu0 %v936_v39  ;;  %v804_v42 = vpop.trf.xlu0  ;;  %3489 = vmatprep.mubr.f32.mxu1 %v4233_v38 }
 0x1ad   :  { %v828_v43 = vsel %vm817_vm1, %v804_v42, 0 }
 0x1ae   :  { %v946_v44 = vand.u32 4294901760, %v945_v40  ;;  %v954_v45 = vand.u32 4294901760, %v4240_v41  ;;  %v4245_v46 = vand.u32 4294901760, %v828_v43 }
 0x1b0   :  { %v4248_v48 = vsub.f32 %v828_v43, %v4245_v46  ;;  %3461 = vmatmul.mubr.f32.vlgmr.msra.gmra.mxu0 %v946_v44  ;;  %3490 = vmatmul.mubr.f32.gmra.mxu1 %v4245_v46  ;;  %v805_v50 = vpop.trf.xlu0  ;;  %v955_v51 = vsub.f32 %v4240_v41, %v954_v45 }
 0x1b1   :  { %3511 = vmatpush3.msra.mxu0 %v1124_v19  ;;  %v831_v52 = vsel %vm817_vm1, %v805_v50, 0 }
 0x1b2   :  { %v964_v53 = vand.u32 4294901760, %v4248_v48  ;;  %v4256_v54 = vand.u32 4294901760, %v831_v52  ;;  %3562 = vmatprep.subr.mxu0 %v4208_v21  ;;  %v956_v55 = vand.u32 4294901760, %v955_v51 }
 0x1b4   :  { %v4260_v56 = vsub.f32 %v831_v52, %v4256_v54  ;;  %3463 = vmatprep.mubr.f32.mxu0 %v956_v55  ;;  %v806_v57 = vpop.trf.xlu0  ;;  %3492 = vmatprep.mubr.f32.mxu1 %v4256_v54  ;;  %v965_v58 = vsub.f32 %v4248_v48, %v964_v53 }
 0x1b5   :  { %v834_v59 = vsel %vm817_vm1, %v806_v57, 0 }
 0x1b6   :  { %v974_v60 = vand.u32 4294901760, %v4260_v56  ;;  %v4268_v63 = vand.u32 4294901760, %v834_v59  ;;  %v966_v0 = vand.u32 4294901760, %v965_v58 }
 0x1b8   :  { %v4271_v1 = vsub.f32 %v834_v59, %v4268_v63  ;;  %3464 = vmatmul.mubr.f32.gmra.mxu0 %v966_v0  ;;  %3493 = vmatmul.mubr.f32.gmra.mxu1 %v4268_v63  ;;  %v807_v2 = vpop.trf.xlu0  ;;  %v975_v3 = vsub.f32 %v4260_v56, %v974_v60 }
 0x1b9   :  { %v837_v5 = vsel %vm817_vm1, %v807_v2, 0 }
 0x1ba   :  { %v984_v6 = vand.u32 4294901760, %v4271_v1  ;;  %v4279_v7 = vand.u32 4294901760, %v837_v5  ;;  %v976_v8 = vand.u32 4294901760, %v975_v3 }
 0x1bc   :  { %v4282_v9 = vsub.f32 %v837_v5, %v4279_v7  ;;  %3466 = vmatprep.mubr.f32.mxu0 %v976_v8  ;;  %v808_v10 = vpop.trf.xlu0  ;;  %3495 = vmatprep.mubr.f32.mxu1 %v4279_v7  ;;  %v985_v11 = vsub.f32 %v4271_v1, %v984_v6 }
 0x1bd   :  { %v840_v12 = vsel %vm817_vm1, %v808_v10, 0 }
 0x1be   :  { %v994_v13 = vand.u32 4294901760, %v4282_v9  ;;  %v4290_v14 = vand.u32 4294901760, %v840_v12  ;;  %v986_v15 = vand.u32 4294901760, %v985_v11 }
 0x1c0   :  { %v4293_v16 = vsub.f32 %v840_v12, %v4290_v14  ;;  %3467 = vmatmul.mubr.f32.gmra.mxu0 %v986_v15  ;;  %3496 = vmatmul.mubr.f32.gmra.mxu1 %v4290_v14  ;;  %v809_v18 = vpop.trf.xlu0  ;;  %v995_v19 = vsub.f32 %v4282_v9, %v994_v13 }
 0x1c1   :  { %v843_v20 = vsel %vm817_vm1, %v809_v18, 0 }
 0x1c2   :  { %v1004_v22 = vand.u32 4294901760, %v4293_v16  ;;  %v4301_v23 = vand.u32 4294901760, %v843_v20  ;;  %v996_v24 = vand.u32 4294901760, %v995_v19 }
 0x1c4   :  { %v4304_v25 = vsub.f32 %v843_v20, %v4301_v23  ;;  %3469 = vmatprep.mubr.f32.mxu0 %v996_v24  ;;  %v810_v28 = vpop.trf.xlu0  ;;  %3498 = vmatprep.mubr.f32.mxu1 %v4301_v23  ;;  %v1005_v29 = vsub.f32 %v4293_v16, %v1004_v22 }
 0x1c5   :  { %v846_v33 = vsel %vm817_vm1, %v810_v28, 0 }
 0x1c6   :  { %v1014_v35 = vand.u32 4294901760, %v4304_v25  ;;  %v4312_v36 = vand.u32 4294901760, %v846_v33  ;;  %v1006_v39 = vand.u32 4294901760, %v1005_v29 }
 0x1c8   :  { %v4315_v40 = vsub.f32 %v846_v33, %v4312_v36  ;;  %3470 = vmatmul.mubr.f32.gmra.mxu0 %v1006_v39  ;;  %3499 = vmatmul.mubr.f32.gmra.mxu1 %v4312_v36  ;;  %v811_v42 = vpop.trf.xlu0  ;;  %v1015_v43 = vsub.f32 %v4304_v25, %v1014_v35 }
 0x1c9   :  { %v849_v44 = vsel %vm817_vm1, %v811_v42, 0 }
 0x1ca   :  { %v1024_v50 = vand.u32 4294901760, %v4315_v40  ;;  %v4323_v51 = vand.u32 4294901760, %v849_v44  ;;  %v1016_v52 = vand.u32 4294901760, %v1015_v43 }
 0x1cc   :  { %v4326_v55 = vsub.f32 %v849_v44, %v4323_v51  ;;  %3472 = vmatprep.mubr.f32.mxu0 %v1016_v52  ;;  %v812_v57 = vpop.trf.xlu0  ;;  %3501 = vmatprep.mubr.f32.mxu1 %v4323_v51  ;;  %v1025_v58 = vsub.f32 %v4315_v40, %v1024_v50 }
 0x1cd   :  { %v852_v59 = vsel %vm817_vm1, %v812_v57, 0 }
 0x1ce   :  { %v1034_v0 = vand.u32 4294901760, %v4326_v55  ;;  %v4334_v2 = vand.u32 4294901760, %v852_v59  ;;  %v1026_v3 = vand.u32 4294901760, %v1025_v58 }
 0x1d0   :  { %v4337_v5 = vsub.f32 %v852_v59, %v4334_v2  ;;  %3473 = vmatmul.mubr.f32.gmra.mxu0 %v1026_v3  ;;  %3502 = vmatmul.mubr.f32.gmra.mxu1 %v4334_v2  ;;  %v813_v8 = vpop.trf.xlu0  ;;  %v1035_v10 = vsub.f32 %v4326_v55, %v1034_v0 }
 0x1d1   :  { %v855_v11 = vsel %vm817_vm1, %v813_v8, 0 }
 0x1d2   :  { %v1044_v12 = vand.u32 4294901760, %v4337_v5  ;;  %v4345_v15 = vand.u32 4294901760, %v855_v11  ;;  %v1036_v18 = vand.u32 4294901760, %v1035_v10 }
 0x1d4   :  { %v4348_v19 = vsub.f32 %v855_v11, %v4345_v15  ;;  %3475 = vmatprep.mubr.f32.mxu0 %v1036_v18  ;;  %v814_v20 = vpop.trf.xlu0  ;;  %3504 = vmatprep.mubr.f32.mxu1 %v4345_v15  ;;  %v1045_v24 = vsub.f32 %v4337_v5, %v1044_v12 }
 0x1d5   :  { %v858_v28 = vsel %vm817_vm1, %v814_v20, 0 }
 0x1d6   :  { %v1054_v29 = vand.u32 4294901760, %v4348_v19  ;;  %v4354_v33 = vand.u32 4294901760, %v858_v28  ;;  %v1046_v39 = vand.u32 4294901760, %v1045_v24 }
 0x1d8   :  { %v1063_v42 = vsub.f32 %v858_v28, %v4354_v33  ;;  %3476 = vmatmul.mubr.f32.gmra.mxu0 %v1046_v39  ;;  %3505 = vmatmul.mubr.f32.gmra.mxu1 %v4354_v33  ;;  %v815_v43 = vpop.trf.xlu0  ;;  %v1055_v44 = vsub.f32 %v4348_v19, %v1054_v29 }
 0x1d9   :  { %v861_v52 = vsel %vm817_vm1, %v815_v43, 0 }
 0x1da   :  { %v1064_v57 = vand.u32 4294901760, %v1063_v42  ;;  %v4360_v58 = vand.u32 4294901760, %v861_v52  ;;  %v1056_v59 = vand.u32 4294901760, %v1055_v44 }
 0x1dc   :  { %v1073_v3 = vsub.f32 %v861_v52, %v4360_v58  ;;  %3478 = vmatprep.mubr.f32.mxu0 %v1056_v59  ;;  %v816_v8 = vpop.trf.xlu0  ;;  %3507 = vmatprep.mubr.f32.mxu1 %v4360_v58  ;;  %v1065_v10 = vsub.f32 %v1063_v42, %v1064_v57 }
 0x1dd   :  { %v864_v11 = vsel %vm817_vm1, %v816_v8, 0 }
 0x1de   :  { %v1074_v18 = vand.u32 4294901760, %v1073_v3  ;;  %v4365_v20 = vand.u32 4294901760, %v864_v11  ;;  %v1066_v24 = vand.u32 4294901760, %v1065_v10 }
 0x1e0   :  { %v1083_v28 = vsub.f32 %v864_v11, %v4365_v20  ;;  %3479 = vmatmul.mubr.f32.gmra.mxu0 %v1066_v24  ;;  %3508 = vmatmul.mubr.f32.gmra.mxu1 %v4365_v20  ;;  %v1075_v39 = vsub.f32 %v1073_v3, %v1074_v18 }
 0x1e1   :  { %3538 = vmatprep.mubr.f32.mxu1 %v934_v30  ;;  %v4451_v30 = vpop.f32.mrf.mxu1 }
 0x1e2   :  { %v1084_v43 = vand.u32 4294901760, %v1083_v28  ;;  %v1076_v44 = vand.u32 4294901760, %v1075_v39  ;;  %5063 = vst [vmem:[#allocation12_spill] sm:$0xff] %v4451_v30 }
 0x1e4   :  { %3481 = vmatprep.mubr.f32.mxu0 %v1076_v44  ;;  %3539 = vmatmul.mubr.f32.vlgmr.msra.gmra.mxu1 %v944_v37  ;;  %v1085_v52 = vsub.f32 %v1083_v28, %v1084_v43 }
 0x1e5   :  { %3589 = vmatpush3.msra.mxu1 %v4203_v17  ;;  %3541 = vmatprep.mubr.f32.mxu1 %v954_v45  ;;  %v638_v17 = vadd.f32 %v4195_v49, %v4191_v34 }
 0x1e6   :  { %v1086_v59 = vand.u32 4294901760, %v1085_v52 }
 0x1e8   :  { %3482 = vmatmul.mubr.f32.gmra.mxu0 %v1086_v59  ;;  %3542 = vmatmul.mubr.f32.gmra.mxu1 %v964_v53 }
 0x1e9   :  { %3512 = vmatprep.mubr.f32.mxu0 %v4216_v27  ;;  %3544 = vmatprep.mubr.f32.mxu1 %v974_v60 }
 0x1ec   :  { %3513 = vmatmul.mubr.f32.vlgmr.msra.gmra.mxu0 %v4224_v32  ;;  %3545 = vmatmul.mubr.f32.gmra.mxu1 %v984_v6 }
 0x1ed   :  { %3563 = vmatpush3.msra.mxu0 %v4208_v21  ;;  %3515 = vmatprep.mubr.f32.mxu0 %v4240_v41  ;;  %v743_v21 = vadd.f32 %v4199_v62, %v638_v17 }
 0x1ee   :  { %3547 = vmatprep.mubr.f32.mxu1 %v994_v13 }
 0x1f0   :  { %3516 = vmatmul.mubr.f32.gmra.mxu0 %v4248_v48  ;;  %3548 = vmatmul.mubr.f32.gmra.mxu1 %v1004_v22 }
 0x1f1   :  { %3518 = vmatprep.mubr.f32.mxu0 %v4260_v56  ;;  %3550 = vmatprep.mubr.f32.mxu1 %v1014_v35 }
 0x1f4   :  { %3519 = vmatmul.mubr.f32.gmra.mxu0 %v4271_v1  ;;  %3551 = vmatmul.mubr.f32.gmra.mxu1 %v1024_v50 }
 0x1f5   :  { %3521 = vmatprep.mubr.f32.mxu0 %v4282_v9  ;;  %3553 = vmatprep.mubr.f32.mxu1 %v1034_v0 }
 0x1f8   :  { %3522 = vmatmul.mubr.f32.gmra.mxu0 %v4293_v16  ;;  %3554 = vmatmul.mubr.f32.gmra.mxu1 %v1044_v12 }
 0x1f9   :  { %3524 = vmatprep.mubr.f32.mxu0 %v4304_v25  ;;  %3556 = vmatprep.mubr.f32.mxu1 %v1054_v29 }
 0x1fc   :  { %3525 = vmatmul.mubr.f32.gmra.mxu0 %v4315_v40  ;;  %3557 = vmatmul.mubr.f32.gmra.mxu1 %v1064_v57 }
 0x1fd   :  { %3527 = vmatprep.mubr.f32.mxu0 %v4326_v55  ;;  %3559 = vmatprep.mubr.f32.mxu1 %v1074_v18 }
 0x200   :  { %3528 = vmatmul.mubr.f32.gmra.mxu0 %v4337_v5  ;;  %3560 = vmatmul.mubr.f32.gmra.mxu1 %v1084_v43 }
 0x201   :  { %3530 = vmatprep.mubr.f32.mxu0 %v4348_v19  ;;  %3590 = vmatprep.mubr.f32.mxu1 %v4213_v26 }
 0x204   :  { %3531 = vmatmul.mubr.f32.gmra.mxu0 %v1063_v42  ;;  %3591 = vmatmul.mubr.f32.vlgmr.msra.gmra.mxu1 %v4221_v31 }
 0x205   :  { %3533 = vmatprep.mubr.f32.mxu0 %v1073_v3  ;;  %3593 = vmatprep.mubr.f32.mxu1 %v4233_v38 }
 0x208   :  { %3534 = vmatmul.mubr.f32.gmra.mxu0 %v1083_v28  ;;  %3594 = vmatmul.mubr.f32.gmra.mxu1 %v4245_v46 }
 0x209   :  { %3564 = vmatprep.mubr.f32.mxu0 %v4213_v26  ;;  %3596 = vmatprep.mubr.f32.mxu1 %v4256_v54  ;;  %v4427_v26 = vand.u32 4294901760, %v743_v21 }
 0x20b   :  { %5061 = vst [vmem:[#allocation10_spill] sm:$0xff] %v4427_v26  ;;  %v4434_v34 = vsub.f32 %v743_v21, %v4427_v26 }
 0x20c   :  { %3565 = vmatmul.mubr.f32.vlgmr.msra.gmra.mxu0 %v4221_v31  ;;  %3597 = vmatmul.mubr.f32.gmra.mxu1 %v4268_v63  ;;  %v4453_v31 = vpop.f32.mrf.mxu0 }
 0x20d   :  { %3567 = vmatprep.mubr.f32.mxu0 %v4233_v38  ;;  %3599 = vmatprep.mubr.f32.mxu1 %v4279_v7  ;;  %5062 = vst [vmem:[#allocation11_spill] sm:$0xff] %v4434_v34  ;;  %v5049_v49 = vand.u32 4294901760, %v4434_v34  ;;  %5064 = vst [vmem:[#allocation13_spill] sm:$0xff] %v4453_v31 }
 0x20f   :  { %v2273_v62 = vsub.f32 %v4434_v34, %v5049_v49 }
 0x210   :  { %3568 = vmatmul.mubr.f32.gmra.mxu0 %v4245_v46  ;;  %3600 = vmatmul.mubr.f32.gmra.mxu1 %v4290_v14 }
 0x211   :  { %3570 = vmatprep.mubr.f32.mxu0 %v4256_v54  ;;  %3602 = vmatprep.mubr.f32.mxu1 %v4301_v23  ;;  %v2274_v27 = vand.u32 4294901760, %v2273_v62 }
 0x214   :  { %3571 = vmatmul.mubr.f32.gmra.mxu0 %v4268_v63  ;;  %3603 = vmatmul.mubr.f32.gmra.mxu1 %v4312_v36 }
 0x215   :  { %3573 = vmatprep.mubr.f32.mxu0 %v4279_v7  ;;  %3605 = vmatprep.mubr.f32.mxu1 %v4323_v51 }
 0x218   :  { %3574 = vmatmul.mubr.f32.gmra.mxu0 %v4290_v14  ;;  %3606 = vmatmul.mubr.f32.gmra.mxu1 %v4334_v2 }
 0x219   :  { %3576 = vmatprep.mubr.f32.mxu0 %v4301_v23  ;;  %3608 = vmatprep.mubr.f32.mxu1 %v4345_v15 }
 0x21c   :  { %3577 = vmatmul.mubr.f32.gmra.mxu0 %v4312_v36  ;;  %3609 = vmatmul.mubr.f32.gmra.mxu1 %v4354_v33 }
 0x21d   :  { %3579 = vmatprep.mubr.f32.mxu0 %v4323_v51  ;;  %3611 = vmatprep.mubr.f32.mxu1 %v4360_v58 }
 0x220   :  { %3580 = vmatmul.mubr.f32.gmra.mxu0 %v4334_v2  ;;  %3612 = vmatmul.mubr.f32.gmra.mxu1 %v4365_v20 }
 0x221   :  { %3582 = vmatprep.mubr.f32.mxu0 %v4345_v15  ;;  %3684 = vmatprep.mubr.f32.mxu1 %v4427_v26 }
 0x224   :  { %3583 = vmatmul.mubr.f32.gmra.mxu0 %v4354_v33 }
 0x225   :  { %3585 = vmatprep.mubr.f32.mxu0 %v4360_v58 }
 0x228   :  { %3586 = vmatmul.mubr.f32.gmra.mxu0 %v4365_v20 }
 0x229   :  { %3646 = vmatprep.mubr.f32.mxu0 %v2274_v27 }
 0x268   :  { %v3488_v32 = vpop.f32.mrf.mxu1 }
 0x26a   :  { %v1164_v41 = vpop.f32.mrf.mxu1 }
 0x270   :  { %v3462_v37 = vpop.f32.mrf.mxu0  ;;  %v3491_v48 = vpop.f32.mrf.mxu1 }
 0x271   :  { %v1171_v38 = vadd.f32 %v3488_v32, %v3462_v37 }
 0x272   :  { %v938_v45 = vpop.f32.mrf.mxu0  ;;  %v1176_v56 = vpop.f32.mrf.mxu1 }
 0x273   :  { %v1165_v46 = vadd.f32 %v1164_v41, %v938_v45 }
 0x278   :  { %v3465_v53 = vpop.f32.mrf.mxu0  ;;  %v3494_v1 = vpop.f32.mrf.mxu1 }
 0x279   :  { %v1183_v54 = vadd.f32 %v3491_v48, %v3465_v53 }
 0x27a   :  { %v958_v60 = vpop.f32.mrf.mxu0  ;;  %v1188_v9 = vpop.f32.mrf.mxu1 }
 0x27b   :  { %v1177_v63 = vadd.f32 %v1176_v56, %v958_v60 }
 0x280   :  { %v3468_v6 = vpop.f32.mrf.mxu0  ;;  %v3497_v16 = vpop.f32.mrf.mxu1 }
 0x281   :  { %v1195_v7 = vadd.f32 %v3494_v1, %v3468_v6 }
 0x282   :  { %v978_v13 = vpop.f32.mrf.mxu0  ;;  %v1200_v25 = vpop.f32.mrf.mxu1 }
 0x283   :  { %v1189_v14 = vadd.f32 %v1188_v9, %v978_v13 }
 0x288   :  { %v3471_v22 = vpop.f32.mrf.mxu0  ;;  %v3500_v40 = vpop.f32.mrf.mxu1 }
 0x289   :  { %v1207_v23 = vadd.f32 %v3497_v16, %v3471_v22 }
 0x28a   :  { %v998_v35 = vpop.f32.mrf.mxu0  ;;  %v1212_v55 = vpop.f32.mrf.mxu1 }
 0x28b   :  { %v1201_v36 = vadd.f32 %v1200_v25, %v998_v35 }
 0x290   :  { %v3474_v50 = vpop.f32.mrf.mxu0  ;;  %v3503_v5 = vpop.f32.mrf.mxu1 }
 0x291   :  { %v4455_v51 = vadd.f32 %v3500_v40, %v3474_v50 }
 0x292   :  { %v1018_v0 = vpop.f32.mrf.mxu0  ;;  %v1224_v12 = vpop.f32.mrf.mxu1 }
 0x293   :  { %v1213_v2 = vadd.f32 %v1212_v55, %v1018_v0 }
 0x298   :  { %v3477_v15 = vpop.f32.mrf.mxu0  ;;  %v3506_v29 = vpop.f32.mrf.mxu1 }
 0x299   :  { %v4457_v19 = vadd.f32 %v3503_v5, %v3477_v15 }
 0x29a   :  { %v1038_v33 = vpop.f32.mrf.mxu0  ;;  %v1236_v57 = vpop.f32.mrf.mxu1 }
 0x29b   :  { %v4459_v42 = vadd.f32 %v1224_v12, %v1038_v33 }
 0x2a0   :  { %v3480_v58 = vpop.f32.mrf.mxu0  ;;  %v4461_v3 = vpop.f32.mrf.mxu1 }
 0x2a1   :  { %v4463_v8 = vadd.f32 %v3506_v29, %v3480_v58 }
 0x2a2   :  { %v1058_v10 = vpop.f32.mrf.mxu0  ;;  %v4465_v11 = vpop.f32.mrf.mxu1 }
 0x2a3   :  { %v4467_v18 = vadd.f32 %v1236_v57, %v1058_v10 }
 0x2a4   :  { %v3540_v20 = vpop.f32.mrf.mxu1 }
 0x2a6   :  { %v1507_v24 = vpop.f32.mrf.mxu1 }
 0x2a8   :  { %v4469_v28 = vpop.f32.mrf.mxu0  ;;  %v3543_v39 = vpop.f32.mrf.mxu1 }
 0x2aa   :  { %v4471_v43 = vpop.f32.mrf.mxu0  ;;  %v1523_v44 = vpop.f32.mrf.mxu1 }
 0x2ac   :  { %v3514_v52 = vpop.f32.mrf.mxu0  ;;  %v3546_v59 = vpop.f32.mrf.mxu1 }
 0x2ad   :  { %v1336_v17 = vadd.f32 %v3514_v52, %v1171_v38 }
 0x2ae   :  { %v1328_v21 = vpop.f32.mrf.mxu0  ;;  %v1539_v62 = vpop.f32.mrf.mxu1 }
 0x2af   :  { %v1329_v27 = vadd.f32 %v1328_v21, %v1165_v46  ;;  %v1516_v32 = vadd.f32 %v3540_v20, %v1336_v17 }
 0x2b0   :  { %v3517_v37 = vpop.f32.mrf.mxu0  ;;  %v3549_v41 = vpop.f32.mrf.mxu1 }
 0x2b1   :  { %v1350_v45 = vadd.f32 %v3517_v37, %v1183_v54  ;;  %v1508_v48 = vadd.f32 %v1507_v24, %v1329_v27 }
 0x2b2   :  { %v1342_v53 = vpop.f32.mrf.mxu0  ;;  %v1555_v56 = vpop.f32.mrf.mxu1 }
 0x2b3   :  { %v1343_v60 = vadd.f32 %v1342_v53, %v1177_v63  ;;  %v1532_v1 = vadd.f32 %v3543_v39, %v1350_v45 }
 0x2b4   :  { %v3520_v6 = vpop.f32.mrf.mxu0  ;;  %v4473_v9 = vpop.f32.mrf.mxu1 }
 0x2b5   :  { %v1364_v13 = vadd.f32 %v3520_v6, %v1195_v7  ;;  %v1524_v16 = vadd.f32 %v1523_v44, %v1343_v60 }
 0x2b6   :  { %v1356_v22 = vpop.f32.mrf.mxu0  ;;  %v1571_v25 = vpop.f32.mrf.mxu1 }
 0x2b7   :  { %v1357_v38 = vadd.f32 %v1356_v22, %v1189_v14  ;;  %v4475_v35 = vadd.f32 %v3546_v59, %v1364_v13 }
 0x2b8   :  { %v3523_v46 = vpop.f32.mrf.mxu0  ;;  %v4477_v40 = vpop.f32.mrf.mxu1 }
 0x2b9   :  { %v1378_v50 = vadd.f32 %v3523_v46, %v1207_v23  ;;  %v4479_v54 = vadd.f32 %v1539_v62, %v1357_v38 }
 0x2ba   :  { %v1370_v55 = vpop.f32.mrf.mxu0  ;;  %v4481_v0 = vpop.f32.mrf.mxu1 }
 0x2bb   :  { %v1371_v63 = vadd.f32 %v1370_v55, %v1201_v36  ;;  %v4483_v5 = vadd.f32 %v3549_v41, %v1378_v50 }
 0x2bc   :  { %v4485_v12 = vpop.f32.mrf.mxu0  ;;  %v3558_v7 = vpop.f32.mrf.mxu1 }
 0x2bd   :  { %v4487_v15 = vadd.f32 %v1555_v56, %v1371_v63 }
 0x2be   :  { %v1384_v14 = vpop.f32.mrf.mxu0  ;;  %v1603_v29 = vpop.f32.mrf.mxu1 }
 0x2bf   :  { %v1385_v33 = vadd.f32 %v1384_v14, %v1213_v2 }
 0x2c0   :  { %v3529_v57 = vpop.f32.mrf.mxu0  ;;  %v3561_v58 = vpop.f32.mrf.mxu1 }
 0x2c1   :  { %v4489_v10 = vadd.f32 %v1571_v25, %v1385_v33 }
 0x2c2   :  { %v1398_v23 = vpop.f32.mrf.mxu0  ;;  %v4491_v20 = vpop.f32.mrf.mxu1 }
 0x2c4   :  { %v3532_v24 = vpop.f32.mrf.mxu0  ;;  %v3592_v39 = vpop.f32.mrf.mxu1 }
 0x2c6   :  { %v1412_v36 = vpop.f32.mrf.mxu0  ;;  %v1863_v44 = vpop.f32.mrf.mxu1 }
 0x2c8   :  { %v3535_v52 = vpop.f32.mrf.mxu0  ;;  %v3595_v59 = vpop.f32.mrf.mxu1 }
 0x2ca   :  { %v1426_v17 = vpop.f32.mrf.mxu0  ;;  %v1875_v21 = vpop.f32.mrf.mxu1 }
 0x2cc   :  { %v3566_v62 = vpop.f32.mrf.mxu0  ;;  %v4493_v27 = vpop.f32.mrf.mxu1 }
 0x2cd   :  { %v1708_v37 = vadd.f32 %v3566_v62, %v1516_v32 }
 0x2ce   :  { %v1701_v2 = vpop.f32.mrf.mxu0  ;;  %v4495_v41 = vpop.f32.mrf.mxu1 }
 0x2cf   :  { %v4497_v45 = vadd.f32 %v3592_v39, %v1708_v37  ;;  %v1702_v53 = vadd.f32 %v1701_v2, %v1508_v48  ;;  %v1255_v37 = vadd.f32 %v4461_v3, %v4469_v28  ;;  %v1413_v2 = vadd.f32 %v1412_v36, %v4467_v18  ;;  %v3066_v18 = vld [vmem:[%s5045_s2 + $0x38] sm:$0xff]  }
 0x2d0   :  { %v3569_v56 = vpop.f32.mrf.mxu0  ;;  %v4499_v60 = vpop.f32.mrf.mxu1  ;;  %v3073_v36 = vld [vmem:[#allocation2 + $0x38] sm:$0xff]   ;;  %v3026_v31 = vunpack.c.l.bf16 %v3066_v18 }
 0x2d1   :  { %v4501_v6 = vadd.f32 %v1863_v44, %v1702_v53  ;;  %v1720_v13 = vadd.f32 %v3569_v56, %v1532_v1  ;;  %v1249_v56 = vadd.f32 %v4465_v11, %v4471_v43  ;;  %v1604_v3 = vadd.f32 %v1603_v29, %v1413_v2 }
 0x2d2   :  { %v1713_v22 = vpop.f32.mrf.mxu0  ;;  %v4503_v25 = vpop.f32.mrf.mxu1  ;;  %v3059_v61 = vunpack.c.h.bf16 %v3073_v36 }
 0x2d3   :  { %v4505_v38 = vadd.f32 %v3595_v59, %v1720_v13  ;;  %v1714_v46 = vadd.f32 %v1713_v22, %v1524_v16  ;;  %v1420_v59 = vadd.f32 %v3532_v24, %v4463_v8  ;;  %v1434_v13 = vadd.f32 %v3535_v52, %v1255_v37  ;;  %v3065_v8 = vld [vmem:[%s5045_s2 + $0x30] sm:$0xff]  }
 0x2d4   :  { %v4507_v50 = vpop.f32.mrf.mxu0  ;;  %v4509_v32 = vpop.f32.mrf.mxu1  ;;  %v1406_v22 = vadd.f32 %v3529_v57, %v4457_v19  ;;  %v1427_v24 = vadd.f32 %v1426_v17, %v1249_v56  ;;  %v3023_v11 = vunpack.c.h.bf16 %v3065_v8  ;;  %v1399_v19 = vadd.f32 %v1398_v23, %v4459_v42  ;;  %v3064_v42 = vld [vmem:[%s5045_s2 + $0x28] sm:$0xff]  }
 0x2d5   :  { %v4511_v55 = vadd.f32 %v1875_v21, %v1714_v46  ;;  %v1612_v49 = vadd.f32 %v3558_v7, %v1420_v59  ;;  %v1628_v43 = vadd.f32 %v3561_v58, %v1434_v13  ;;  %v3055_v17 = vunpack.c.h.bf16 %v3072_v4 }
 0x2d6   :  { %v4513_v63 = vpop.f32.mrf.mxu0  ;;  %v4515_v48 = vpop.f32.mrf.mxu1  ;;  %v1596_v7 = vadd.f32 %v4477_v40, %v1406_v22  ;;  %v1620_v29 = vadd.f32 %v4491_v20, %v1427_v24  ;;  %v3022_v56 = vunpack.c.l.bf16 %v3065_v8  ;;  %v1588_v13 = vadd.f32 %v4481_v0, %v1399_v19 }
 0x2d7   :  { %v3058_v8 = vunpack.c.l.bf16 %v3073_v36 }
 0x2d8   :  { %v4517_v14 = vpop.f32.mrf.mxu0  ;;  %v3607_v33 = vpop.f32.mrf.mxu1 }
 0x2da   :  { %v4519_v1 = vpop.f32.mrf.mxu0  ;;  %v4521_v39 = vpop.f32.mrf.mxu1 }
 0x2dc   :  { %v4523_v44 = vpop.f32.mrf.mxu0  ;;  %v3610_v62 = vpop.f32.mrf.mxu1 }
 0x2de   :  { %v4525_v16 = vpop.f32.mrf.mxu0  ;;  %v1935_v46 = vpop.f32.mrf.mxu1 }
 0x2e0   :  { %v3581_v21 = vpop.f32.mrf.mxu0  ;;  %v3613_v57 = vpop.f32.mrf.mxu1 }
 0x2e1   :  { %v1768_v2 = vadd.f32 %v3581_v21, %v1596_v7 }
 0x2e2   :  { %v1761_v53 = vpop.f32.mrf.mxu0  ;;  %v1947_v22 = vpop.f32.mrf.mxu1 }
 0x2e3   :  { %v1930_v24 = vadd.f32 %v3607_v33, %v1768_v2 }
 0x2e4   :  { %v3584_v26 = vpop.f32.mrf.mxu0 }
 0x2e5   :  { %v1780_v34 = vadd.f32 %v3584_v26, %v1612_v49  ;;  %v3027_v49 = vunpack.c.h.bf16 %v3066_v18  ;;  %v1762_v18 = vadd.f32 %v1761_v53, %v1588_v13  ;;  %v3018_v53 = vunpack.c.l.bf16 %v3064_v42 }
 0x2e6   :  { %v1773_v28 = vpop.f32.mrf.mxu0 }
 0x2e7   :  { %v1942_v52 = vadd.f32 %v3610_v62, %v1780_v34  ;;  %v1774_v59 = vadd.f32 %v1773_v28, %v1604_v3  ;;  %v1392_v62 = vadd.f32 %v4485_v12, %v4455_v51  ;;  %v3019_v3 = vunpack.c.h.bf16 %v3064_v42  ;;  %v3071_v28 = vld [vmem:[#allocation2 + $0x28] sm:$0xff]   ;;  %v3063_v12 = vld [vmem:[%s5045_s2 + $0x20] sm:$0xff]  }
 0x2e8   :  { %v3587_v37 = vpop.f32.mrf.mxu0  ;;  %v1924_v36 = vadd.f32 %v4521_v39, %v1762_v18  ;;  %v1744_v42 = vadd.f32 %v4517_v14, %v4483_v5  ;;  %v1732_v18 = vadd.f32 %v4507_v50, %v4475_v35  ;;  %v1726_v50 = vadd.f32 %v4513_v63, %v4479_v54  ;;  %v3060_v54 = vld [vmem:[%s5045_s2 + $0x8] sm:$0xff]  }
 0x2e9   :  { %v1792_v26 = vadd.f32 %v3587_v37, %v1628_v43  ;;  %v2002_v58 = vmul.f32 %v3023_v11, %v1942_v52  ;;  %v1936_v40 = vadd.f32 %v1935_v46, %v1774_v59  ;;  %v3054_v43 = vunpack.c.l.bf16 %v3072_v4 }
 0x2ea   :  { %v1785_v30 = vpop.f32.mrf.mxu0  ;;  %v2000_v33 = vmul.f32 %v3019_v3, %v1930_v24  ;;  %v1999_v2 = vmul.f32 %v3018_v53, %v1924_v36  ;;  %v1894_v35 = vadd.f32 %v4493_v27, %v1732_v18 }
 0x2eb   :  { %v1954_v23 = vadd.f32 %v3613_v57, %v1792_v26  ;;  %v1786_v34 = vadd.f32 %v1785_v30, %v1620_v29  ;;  %v2050_v7 = vadd.f32 %v3055_v17, %v2002_v58  ;;  %v2001_v37 = vmul.f32 %v3022_v56, %v1936_v40  ;;  %v3070_v26 = vld [vmem:[#allocation2 + $0x20] sm:$0xff]   ;;  %v3062_v40 = vld [vmem:[%s5045_s2 + $0x18] sm:$0xff]  }
 0x2ec   :  { %v1580_v30 = vadd.f32 %v4473_v9, %v1392_v62  ;;  %v3051_v57 = vunpack.c.h.bf16 %v3071_v28  ;;  %v3050_v29 = vunpack.c.l.bf16 %v3071_v28  ;;  %v3047_v39 = vunpack.c.h.bf16 %v3070_v26 }
 0x2ed   :  { %v2004_v20 = vmul.f32 %v3027_v49, %v1954_v23  ;;  %v1948_v21 = vadd.f32 %v1947_v22, %v1786_v34  ;;  %v2993_v4 = vadd.f32 -1.0, %v2050_v7  ;;  %v2049_v19 = vadd.f32 %v3054_v43, %v2001_v37 }
 0x2ee   :  { %v1756_v0 = vadd.f32 %v4523_v44, %v1580_v30  ;;  %v1750_v44 = vadd.f32 %v4525_v16, %v4489_v10  ;;  %v2048_v49 = vadd.f32 %v3051_v57, %v2000_v33  ;;  %v3014_v34 = vunpack.c.l.bf16 %v3063_v12 }
 0x2ef   :  { %v2052_v11 = vadd.f32 %v3059_v61, %v2004_v20  ;;  %v2003_v46 = vmul.f32 %v3026_v31, %v1948_v21  ;;  %v3015_v31 = vunpack.c.h.bf16 %v3063_v12  ;;  %v2095_v56 = vmul.f32 1.442695, %v2993_v4  ;;  %v3069_v20 = vld [vmem:[#allocation2 + $0x18] sm:$0xff]  }
 0x2f0   :  { %v1918_v17 = vadd.f32 %v4509_v32, %v1756_v0  ;;  %v2992_v58 = vadd.f32 -1.0, %v2049_v19  ;;  %v1912_v32 = vadd.f32 %v4515_v48, %v1750_v44  ;;  %v2991_v62 = vadd.f32 -1.0, %v2048_v49 }
 0x2f1   :  { %v2995_v52 = vadd.f32 -1.0, %v2052_v11  ;;  %v2051_v51 = vadd.f32 %v3058_v8, %v2003_v46  ;;  %v2047_v10 = vadd.f32 %v3050_v29, %v1999_v2  ;;  %v3011_v13 = vunpack.c.h.bf16 %v3062_v40 }
 0x2f2   :  { %v1998_v23 = vmul.f32 %v3015_v31, %v1918_v17  ;;  %v2093_v16 = vmul.f32 1.442695, %v2992_v58  ;;  %v1906_v22 = vadd.f32 %v4499_v60, %v1744_v42  ;;  %v1738_v21 = vadd.f32 %v4519_v1, %v4487_v15  ;;  %v3061_v60 = vld [vmem:[%s5045_s2 + $0x10] sm:$0xff]  }
 0x2f3   :  { %v2099_v59 = vmul.f32 1.442695, %v2995_v52  ;;  %v2994_v61 = vadd.f32 -1.0, %v2051_v51  ;;  %v3046_v14 = vunpack.c.l.bf16 %v3070_v26  ;;  %v1997_v8 = vmul.f32 %v3014_v34, %v1912_v32  ;;  %v3067_v26 = vld [vmem:[#allocation2 + $0x8] sm:$0xff]  }
 0x2f4   :  { %v2046_v5 = vadd.f32 %v3047_v39, %v1998_v23  ;;  %v2091_v24 = vmul.f32 1.442695, %v2991_v62  ;;  %v2990_v3 = vadd.f32 -1.0, %v2047_v10  ;;  %v3043_v28 = vunpack.c.h.bf16 %v3069_v20  ;;  %v2997_v39 = vld [vmem:[%s5045_s2] sm:$0xff]  }
 0x2f5   :  { %3856 = vpow2.f32 %v2099_v59  ;;  %v2097_v9 = vmul.f32 1.442695, %v2994_v61  ;;  %v1996_v43 = vmul.f32 %v3011_v13, %v1906_v22  ;;  %v1900_v7 = vadd.f32 %v4503_v25, %v1738_v21  ;;  %v3068_v25 = vld [vmem:[#allocation2 + $0x10] sm:$0xff]  }
 0x2f6   :  { %v3010_v15 = vunpack.c.l.bf16 %v3062_v40  ;;  %v2989_v1 = vadd.f32 -1.0, %v2046_v5  ;;  %v2045_v37 = vadd.f32 %v3046_v14, %v1997_v8  ;;  %v2089_v11 = vmul.f32 1.442695, %v2990_v3 }
 0x2f7   :  { %3858 = vpow2.f32 %v2097_v9  ;;  %v3007_v30 = vunpack.c.h.bf16 %v3061_v60  ;;  %v3042_v52 = vunpack.c.l.bf16 %v3069_v20  ;;  %v2044_v51 = vadd.f32 %v3043_v28, %v1996_v43 }
 0x2f8   :  { %3860 = vpow2.f32 %v2095_v56  ;;  %v1995_v57 = vmul.f32 %v3010_v15, %v1900_v7  ;;  %v2087_v0 = vmul.f32 1.442695, %v2989_v1  ;;  %v2988_v12 = vadd.f32 -1.0, %v2045_v37 }
 0x2f9   :  { %3862 = vpow2.f32 %v2093_v16  ;;  %v1994_v36 = vmul.f32 %v3007_v30, %v1894_v35  ;;  %v3039_v53 = vunpack.c.h.bf16 %v3068_v25  ;;  %v1888_v4 = vadd.f32 %v4495_v41, %v1726_v50  ;;  %v3029_v16 = vld [vmem:[#allocation2] sm:$0xff]  }
 0x2fa   :  { %3864 = vpow2.f32 %v2091_v24  ;;  %v3006_v19 = vunpack.c.l.bf16 %v3061_v60  ;;  %v2987_v27 = vadd.f32 -1.0, %v2044_v51  ;;  %v2043_v63 = vadd.f32 %v3042_v52, %v1995_v57 }
 0x2fb   :  { %3866 = vpow2.f32 %v2089_v11  ;;  %v2085_v59 = vmul.f32 1.442695, %v2988_v12  ;;  %v3003_v31 = vunpack.c.h.bf16 %v3060_v54  ;;  %v2042_v9 = vadd.f32 %v3039_v53, %v1994_v36 }
 0x2fc   :  { %3868 = vpow2.f32 %v2087_v0  ;;  %v3038_v17 = vunpack.c.l.bf16 %v3068_v25  ;;  %v1993_v44 = vmul.f32 %v3006_v19, %v1888_v4  ;;  %v2083_v49 = vmul.f32 1.442695, %v2987_v27  ;;  %v2165_v27 = vld [vmem:[%s5047_s4] sm:$0xff] }
 0x2fd   :  { %v2986_v41 = vadd.f32 -1.0, %v2043_v63  ;;  %3870 = vpow2.f32 %v2085_v59  ;;  %v1992_v2 = vmul.f32 %v3003_v31, %v4505_v38  ;;  %v3035_v56 = vunpack.c.h.bf16 %v3067_v26 }
 0x2fe   :  { %v3002_v58 = vunpack.c.l.bf16 %v3060_v54  ;;  %v2985_v42 = vadd.f32 -1.0, %v2042_v9  ;;  %v2041_v40 = vadd.f32 %v3038_v17, %v1993_v44  ;;  %3872 = vpow2.f32 %v2083_v49 }
 0x2ff   :  { %v2081_v23 = vmul.f32 1.442695, %v2986_v41  ;;  %v2999_v34 = vunpack.c.h.bf16 %v2997_v39  ;;  %v2040_v62 = vadd.f32 %v3035_v56, %v1992_v2  ;;  %v3034_v10 = vunpack.c.l.bf16 %v3067_v26  ;;  %v2166_v41 = vld [vmem:[%s5047_s4 + $0x8] sm:$0xff] }
 0x300   :  { %v1991_v38 = vmul.f32 %v3002_v58, %v4511_v55  ;;  %v2079_v13 = vmul.f32 1.442695, %v2985_v42  ;;  %v2984_v22 = vadd.f32 -1.0, %v2041_v40  ;;  %v3031_v5 = vunpack.c.h.bf16 %v3029_v16 }
 0x301   :  { %3874 = vpow2.f32 %v2081_v23  ;;  %v1990_v21 = vmul.f32 %v2999_v34, %v4497_v45  ;;  %v2998_v14 = vunpack.c.l.bf16 %v2997_v39  ;;  %v2983_v8 = vadd.f32 -1.0, %v2040_v62  ;;  %v2167_v23 = vld [vmem:[%s5047_s4 + $0x10] sm:$0xff] }
 0x302   :  { %v4567_v48 = vpop.eup %3856  ;;  %v2039_v24 = vadd.f32 %v3034_v10, %v1991_v38  ;;  %3876 = vpow2.f32 %v2079_v13  ;;  %v2077_v3 = vmul.f32 1.442695, %v2984_v22  ;;  %v3030_v18 = vunpack.c.l.bf16 %v3029_v16 }
 0x303   :  { %2131 = vadd.xlane.f32.xlu0 %v4567_v48  ;;  %v2038_v55 = vadd.f32 %v3031_v5, %v1990_v21  ;;  %v1989_v60 = vmul.f32 %v2998_v14, %v4501_v6  ;;  %v2075_v43 = vmul.f32 1.442695, %v2983_v8  ;;  %v3967_v59 = vmov 0  }
 0x304   :  { %v4576_v46 = vpop.eup %3858  ;;  %v2982_v7 = vadd.f32 -1.0, %v2039_v24  ;;  %3878 = vpow2.f32 %v2077_v3  ;;  %3850 = vset.pattern.permute.xlu1 %v3967_v59  ;;  %3851 = vset.pattern.permute.xlu0 %v3967_v59 }
 0x305   :  { %2129 = vadd.xlane.f32.xlu1 %v4576_v46  ;;  %v4582_v33 = vpop.eup %3860  ;;  %v2981_v45 = vadd.f32 -1.0, %v2038_v55  ;;  %v2037_v1 = vadd.f32 %v3030_v18, %v1989_v60  ;;  %3880 = vpow2.f32 %v2075_v43 }
 0x306   :  { %v4589_v61 = vpop.eup %3862  ;;  %v2073_v37 = vmul.f32 1.442695, %v2982_v7 }
 0x307   :  { %v4592_v29 = vpop.eup %3864  ;;  %v2071_v30 = vmul.f32 1.442695, %v2981_v45  ;;  %v2980_v35 = vadd.f32 -1.0, %v2037_v1 }
 0x308   :  { %v4599_v32 = vpop.eup %3866  ;;  %3882 = vpow2.f32 %v2073_v37 }
 0x309   :  { %2127 = vadd.xlane.f32.xlu1 %v4582_v33  ;;  %v4603_v20 = vpop.eup %3868  ;;  %3884 = vpow2.f32 %v2071_v30  ;;  %v2069_v6 = vmul.f32 1.442695, %v2980_v35 }
 0x30a   :  { %v4607_v28 = vpop.eup %3870 }
 0x30b   :  { %v4611_v15 = vpop.eup %3872  ;;  %3886 = vpow2.f32 %v2069_v6 }
 0x30d   :  { %2125 = vadd.xlane.f32.xlu1 %v4589_v61 }
 0x30e   :  { %v4614_v11 = vpop.eup %3874 }
 0x30f   :  { %v4617_v50 = vpop.eup %3876 }
 0x311   :  { %2123 = vadd.xlane.f32.xlu1 %v4592_v29  ;;  %v4620_v57 = vpop.eup %3878 }
 0x312   :  { %v4623_v52 = vpop.eup %3880 }
 0x315   :  { %2121 = vadd.xlane.f32.xlu1 %v4599_v32  ;;  %v4626_v25 = vpop.eup %3882 }
 0x316   :  { %v4629_v51 = vpop.eup %3884 }
 0x318   :  { %v4632_v0 = vpop.eup %3886 }
 0x319   :  { %2119 = vadd.xlane.f32.xlu1 %v4603_v20 }
 0x31d   :  { %2117 = vadd.xlane.f32.xlu1 %v4607_v28 }
 0x321   :  { %2115 = vadd.xlane.f32.xlu1 %v4611_v15 }
 0x325   :  { %2113 = vadd.xlane.f32.xlu1 %v4614_v11 }
 0x329   :  { %2111 = vadd.xlane.f32.xlu1 %v4617_v50 }
 0x32d   :  { %2109 = vadd.xlane.f32.xlu1 %v4620_v57 }
 0x331   :  { %2107 = vadd.xlane.f32.xlu1 %v4623_v52 }
 0x335   :  { %2105 = vadd.xlane.f32.xlu1 %v4626_v25 }
 0x339   :  { %2103 = vadd.xlane.f32.xlu1 %v4629_v51 }
 0x33d   :  { %2101 = vadd.xlane.f32.xlu1 %v4632_v0 }
 0x34e   :  { %2171 = vperm.xlu1 %3850, %v2165_v27  }
 0x352   :  { %2176 = vperm.xlu1 %3850, %v2166_v41  }
 0x356   :  { %2181 = vperm.xlu1 %3850, %v2167_v23  }
 0x38c   :  { %v2132_v12 = vpop.xlane.xlu0 %2131 }
 0x38d   :  { %3888 = vrcp.f32 %v2132_v12 }
 0x38e   :  { %v2130_v36 = vpop.xlane.xlu1 %2129 }
 0x38f   :  { %3890 = vrcp.f32 %v2130_v36 }
 0x392   :  { %v2128_v53 = vpop.xlane.xlu1 %2127 }
 0x393   :  { %3892 = vrcp.f32 %v2128_v53 }
 0x396   :  { %v2126_v4 = vpop.xlane.xlu1 %2125 }
 0x397   :  { %3894 = vrcp.f32 %v2126_v4 }
 0x39a   :  { %v3889_v19 = vpop.eup %3888  ;;  %v2124_v54 = vpop.xlane.xlu1 %2123 }
 0x39b   :  { %v2164_v63 = vmul.f32 %v3889_v19, %v4567_v48  ;;  %3896 = vrcp.f32 %v2124_v54 }
 0x39c   :  { %v3891_v31 = vpop.eup %3890 }
 0x39d   :  { %v4639_v9 = vand.u32 4294901760, %v2164_v63  ;;  %v2163_v17 = vmul.f32 %v3891_v31, %v4576_v46 }
 0x39e   :  { %v2122_v26 = vpop.xlane.xlu1 %2121 }
 0x39f   :  { %v4642_v44 = vand.u32 4294901760, %v2163_v17  ;;  %3898 = vrcp.f32 %v2122_v26  ;;  %3614 = vmatprep.subr.mxu0 %v4639_v9  ;;  %v4646_v49 = vsub.f32 %v2164_v63, %v4639_v9 }
 0x3a0   :  { %v3893_v48 = vpop.eup %3892  ;;  %3615 = vmatpush3.xpose.msra.mxu0 %v4639_v9 }
 0x3a1   :  { %v2162_v2 = vmul.f32 %v3893_v48, %v4582_v33  ;;  %3616 = vmatprep.subr.mxu0 %v4642_v44  ;;  %v4655_v46 = vand.u32 4294901760, %v4646_v49  ;;  %v4658_v56 = vsub.f32 %v2163_v17, %v4642_v44 }
 0x3a2   :  { %v2120_v58 = vpop.xlane.xlu1 %2119 }
 0x3a3   :  { %v4660_v39 = vand.u32 4294901760, %v2162_v2  ;;  %3900 = vrcp.f32 %v2120_v58  ;;  %v2314_v42 = vsub.f32 %v4646_v49, %v4655_v46  ;;  %v4665_v40 = vand.u32 4294901760, %v4658_v56 }
 0x3a4   :  { %v3895_v33 = vpop.eup %3894  ;;  %3617 = vmatpush3.xpose.msra.mxu0 %v4642_v44 }
 0x3a5   :  { %v2161_v34 = vmul.f32 %v3895_v33, %v4589_v61  ;;  %3618 = vmatprep.subr.mxu0 %v4660_v39  ;;  %v2315_v62 = vand.u32 4294901760, %v2314_v42  ;;  %v2321_v10 = vsub.f32 %v4658_v56, %v4665_v40  ;;  %v4676_v16 = vsub.f32 %v2162_v2, %v4660_v39  ;;  %v2168_v61 = vld [vmem:[%s5047_s4 + $0x18] sm:$0xff]  ;;  %s3968_s4 = smov [#allocation5]  }
 0x3a6   :  { %v2118_v38 = vpop.xlane.xlu1 %2117  ;;  %2186 = vperm.xlu1 %3850, %v2168_v61   ;;  %s2968_s0 = sshll.u32 %s3968_s4, 4  ;;  %s2969_s0 = int_to_ptr.vmem [resolvable:$true] %s2968_s0 }
 0x3a7   :  { %v4678_v13 = vand.u32 4294901760, %v2161_v34  ;;  %3902 = vrcp.f32 %v2118_v38  ;;  %3652 = vmatprep.subr.mxu1 %v2315_v62  ;;  %v2322_v22 = vand.u32 4294901760, %v2321_v10  ;;  %v4681_v21 = vand.u32 4294901760, %v4676_v16  ;;  %s3940_s14 = scalar_lea.vmem %s2969_s0, 512  ;;  %p3945_p6 = scmp.lt.s32.totalorder %s2969_s0, %s2969_s0 }
 0x3a8   :  { %v3897_v5 = vpop.eup %3896  ;;  %3619 = vmatpush3.xpose.msra.mxu0 %v4660_v39  ;;  %3653 = vmatpush3.xpose.msra.mxu1 %v2315_v62  ;;  %p3941_p5 = scmp.ne.s32.totalorder %s2969_s0, %s3940_s14  ;;  %p3946_p7 = scmp.lt.s32.totalorder %s3940_s14, %s3940_s14 }
 0x3a9   :  { %v2160_v14 = vmul.f32 %v3897_v5, %v4592_v29  ;;  %3620 = vmatprep.subr.mxu0 %v4678_v13  ;;  %3654 = vmatprep.subr.mxu1 %v2322_v22  ;;  %v2328_v8 = vsub.f32 %v4676_v16, %v4681_v21  ;;  %v4692_v24 = vsub.f32 %v2161_v34, %v4678_v13 }
 0x3aa   :  { %v2116_v3 = vpop.xlane.xlu1 %2115  ;;  %p3947_p8 = por %p3946_p7, %p3945_p6 }
 0x3ab   :  { %v4694_v55 = vand.u32 4294901760, %v2160_v14  ;;  %3904 = vrcp.f32 %v2116_v3  ;;  %v2329_v18 = vand.u32 4294901760, %v2328_v8  ;;  %v4697_v60 = vand.u32 4294901760, %v4692_v24 }
 0x3ac   :  { %v3899_v43 = vpop.eup %3898  ;;  %3621 = vmatpush3.xpose.msra.mxu0 %v4678_v13  ;;  %3655 = vmatpush3.xpose.msra.mxu1 %v2322_v22  ;;  %p3948_p9 = pnand %p3947_p8, %p3941_p5 }
 0x3ad   :  { %v2159_v29 = vmul.f32 %v3899_v43, %v4599_v32  ;;  %3622 = vmatprep.subr.mxu0 %v4694_v55  ;;  %3656 = vmatprep.subr.mxu1 %v2329_v18  ;;  %v2335_v7 = vsub.f32 %v4692_v24, %v4697_v60  ;;  %v4705_v45 = vsub.f32 %v2160_v14, %v4694_v55 }
 0x3ae   :  { %v2114_v1 = vpop.xlane.xlu1 %2113 }
 0x3af   :  { %v4707_v37 = vand.u32 4294901760, %v2159_v29  ;;  %3906 = vrcp.f32 %v2114_v1  ;;  %v2336_v30 = vand.u32 4294901760, %v2335_v7  ;;  %v4710_v35 = vand.u32 4294901760, %v4705_v45 }
 0x3b0   :  { %v3901_v6 = vpop.eup %3900  ;;  %3623 = vmatpush3.xpose.msra.mxu0 %v4694_v55  ;;  %3657 = vmatpush3.xpose.msra.mxu1 %v2329_v18 }
 0x3b1   :  { %v2158_v32 = vmul.f32 %v3901_v6, %v4603_v20  ;;  %3624 = vmatprep.subr.mxu0 %v4707_v37  ;;  %3658 = vmatprep.subr.mxu1 %v2336_v30  ;;  %v2342_v12 = vsub.f32 %v4705_v45, %v4710_v35  ;;  %v4718_v36 = vsub.f32 %v2159_v29, %v4707_v37 }
 0x3b2   :  { %v2112_v53 = vpop.xlane.xlu1 %2111 }
 0x3b3   :  { %v4720_v4 = vand.u32 4294901760, %v2158_v32  ;;  %3908 = vrcp.f32 %v2112_v53  ;;  %v2343_v19 = vand.u32 4294901760, %v2342_v12  ;;  %v4723_v54 = vand.u32 4294901760, %v4718_v36 }
 0x3b4   :  { %v3903_v27 = vpop.eup %3902  ;;  %3625 = vmatpush3.xpose.msra.mxu0 %v4707_v37  ;;  %3659 = vmatpush3.xpose.msra.mxu1 %v2336_v30 }
 0x3b5   :  { %v2157_v20 = vmul.f32 %v3903_v27, %v4607_v28  ;;  %3626 = vmatprep.subr.mxu0 %v4720_v4  ;;  %3660 = vmatprep.subr.mxu1 %v2343_v19  ;;  %v2349_v63 = vsub.f32 %v4718_v36, %v4723_v54  ;;  %v4731_v59 = vsub.f32 %v2158_v32, %v4720_v4 }
 0x3b6   :  { %v2110_v31 = vpop.xlane.xlu1 %2109 }
 0x3b7   :  { %v4733_v17 = vand.u32 4294901760, %v2157_v20  ;;  %3910 = vrcp.f32 %v2110_v31  ;;  %v2350_v26 = vand.u32 4294901760, %v2349_v63  ;;  %v4736_v48 = vand.u32 4294901760, %v4731_v59 }
 0x3b8   :  { %v3905_v41 = vpop.eup %3904  ;;  %3627 = vmatpush3.xpose.msra.mxu0 %v4720_v4  ;;  %3661 = vmatpush3.xpose.msra.mxu1 %v2343_v19 }
 0x3b9   :  { %v2156_v28 = vmul.f32 %v3905_v41, %v4611_v15  ;;  %3628 = vmatprep.subr.mxu0 %v4733_v17  ;;  %3662 = vmatprep.subr.mxu1 %v2350_v26  ;;  %v2356_v2 = vsub.f32 %v4731_v59, %v4736_v48  ;;  %v4744_v58 = vsub.f32 %v2157_v20, %v4733_v17 }
 0x3ba   :  { %v2108_v42 = vpop.xlane.xlu1 %2107 }
 0x3bb   :  { %v4746_v33 = vand.u32 4294901760, %v2156_v28  ;;  %3912 = vrcp.f32 %v2108_v42  ;;  %v2357_v23 = vand.u32 4294901760, %v2356_v2  ;;  %v4749_v34 = vand.u32 4294901760, %v4744_v58 }
 0x3bc   :  { %v3907_v62 = vpop.eup %3906  ;;  %3629 = vmatpush3.xpose.msra.mxu0 %v4733_v17  ;;  %3663 = vmatpush3.xpose.msra.mxu1 %v2350_v26 }
 0x3bd   :  { %v2155_v15 = vmul.f32 %v3907_v62, %v4614_v11  ;;  %3630 = vmatprep.subr.mxu0 %v4746_v33  ;;  %3664 = vmatprep.subr.mxu1 %v2357_v23  ;;  %v2363_v10 = vsub.f32 %v4744_v58, %v4749_v34  ;;  %v4757_v38 = vsub.f32 %v2156_v28, %v4746_v33  ;;  %v5066_v28 = vld [vmem:[#allocation12_spill] sm:$0xff] }
 0x3be   :  { %v2106_v22 = vpop.xlane.xlu1 %2105 }
 0x3bf   :  { %v4759_v61 = vand.u32 4294901760, %v2155_v15  ;;  %3914 = vrcp.f32 %v2106_v22  ;;  %v2364_v5 = vand.u32 4294901760, %v2363_v10  ;;  %v4762_v14 = vand.u32 4294901760, %v4757_v38 }
 0x3c0   :  { %v3909_v8 = vpop.eup %3908  ;;  %3631 = vmatpush3.xpose.msra.mxu0 %v4746_v33  ;;  %3665 = vmatpush3.xpose.msra.mxu1 %v2357_v23 }
 0x3c1   :  { %v2154_v11 = vmul.f32 %v3909_v8, %v4617_v50  ;;  %3632 = vmatprep.subr.mxu0 %v4759_v61  ;;  %3666 = vmatprep.subr.mxu1 %v2364_v5  ;;  %v2370_v3 = vsub.f32 %v4757_v38, %v4762_v14  ;;  %v4770_v18 = vsub.f32 %v2155_v15, %v4759_v61  ;;  %v5067_v15 = vld [vmem:[#allocation8_spill] sm:$0xff] }
 0x3c2   :  { %v2104_v43 = vpop.xlane.xlu1 %2103 }
 0x3c3   :  { %v4772_v29 = vand.u32 4294901760, %v2154_v11  ;;  %3916 = vrcp.f32 %v2104_v43  ;;  %v2371_v7 = vand.u32 4294901760, %v2370_v3  ;;  %v4775_v1 = vand.u32 4294901760, %v4770_v18 }
 0x3c4   :  { %v3911_v30 = vpop.eup %3910  ;;  %3633 = vmatpush3.xpose.msra.mxu0 %v4759_v61  ;;  %3667 = vmatpush3.xpose.msra.mxu1 %v2364_v5 }
 0x3c5   :  { %v2153_v50 = vmul.f32 %v3911_v30, %v4620_v57  ;;  %3634 = vmatprep.subr.mxu0 %v4772_v29  ;;  %3668 = vmatprep.subr.mxu1 %v2371_v7  ;;  %v2377_v6 = vsub.f32 %v4770_v18, %v4775_v1  ;;  %v4783_v32 = vsub.f32 %v2154_v11, %v4772_v29  ;;  %v5065_v57 = vld [vmem:[#allocation13_spill] sm:$0xff] }
 0x3c6   :  { %v2102_v12 = vpop.xlane.xlu1 %2101  ;;  %v650_v63 = vadd.f32 %v5065_v57, %v4193_v47  ;;  %v5068_v30 = vld [vmem:[#allocation9_spill] sm:$0xff] }
 0x3c7   :  { %v4785_v53 = vand.u32 4294901760, %v2153_v50  ;;  %3918 = vrcp.f32 %v2102_v12  ;;  %v2378_v19 = vand.u32 4294901760, %v2377_v6  ;;  %v4788_v27 = vand.u32 4294901760, %v4783_v32 }
 0x3c8   :  { %v3913_v20 = vpop.eup %3912  ;;  %3635 = vmatpush3.xpose.msra.mxu0 %v4772_v29  ;;  %3669 = vmatpush3.xpose.msra.mxu1 %v2371_v7  ;;  %v755_v2 = vadd.f32 %v5066_v28, %v650_v63 }
 0x3c9   :  { %v2152_v31 = vmul.f32 %v3913_v20, %v4623_v52  ;;  %3636 = vmatprep.subr.mxu0 %v4785_v53  ;;  %3670 = vmatprep.subr.mxu1 %v2378_v19  ;;  %v2384_v26 = vsub.f32 %v4783_v32, %v4788_v27  ;;  %v4798_v41 = vsub.f32 %v2153_v50, %v4785_v53  ;;  %v4807_v52 = vand.u32 4294901760, %v5067_v15 }
 0x3ca   :  { %v4817_v8 = vand.u32 4294901760, %v755_v2  ;;  %v4829_v50 = vand.u32 4294901760, %v5068_v30 }
 0x3cb   :  { %v4801_v42 = vand.u32 4294901760, %v2152_v31  ;;  %v2385_v23 = vand.u32 4294901760, %v2384_v26  ;;  %v4804_v47 = vand.u32 4294901760, %v4798_v41 }
 0x3cc   :  { %v3915_v62 = vpop.eup %3914  ;;  %3637 = vmatpush3.xpose.msra.mxu0 %v4785_v53  ;;  %3671 = vmatpush3.xpose.msra.mxu1 %v2378_v19  ;;  %v4840_v20 = vsub.f32 %v755_v2, %v4817_v8 }
 0x3cd   :  { %v2151_v10 = vmul.f32 %v3915_v62, %v4626_v25  ;;  %3638 = vmatprep.subr.mxu0 %v4801_v42  ;;  %3672 = vmatprep.subr.mxu1 %v2385_v23  ;;  %v2391_v22 = vsub.f32 %v4798_v41, %v4804_v47  ;;  %v4815_v5 = vsub.f32 %v2152_v31, %v4801_v42 }
 0x3ce   :  { %v4826_v25 = vsub.f32 %v5067_v15, %v4807_v52  ;;  %v2292_v15 = vand.u32 4294901760, %v4840_v20 }
 0x3cf   :  { %v4819_v11 = vand.u32 4294901760, %v2151_v10  ;;  %v2392_v3 = vand.u32 4294901760, %v2391_v22  ;;  %v4822_v43 = vand.u32 4294901760, %v4815_v5 }
 0x3d0   :  { %v3917_v7 = vpop.eup %3916  ;;  %3639 = vmatpush3.xpose.msra.mxu0 %v4801_v42  ;;  %3673 = vmatpush3.xpose.msra.mxu1 %v2385_v23  ;;  %v5056_v28 = vand.u32 4294901760, %v4826_v25 }
 0x3d1   :  { %v2150_v6 = vmul.f32 %v3917_v7, %v4629_v51  ;;  %3640 = vmatprep.subr.mxu0 %v4819_v11  ;;  %3674 = vmatprep.subr.mxu1 %v2392_v3  ;;  %v2398_v12 = vsub.f32 %v4815_v5, %v4822_v43  ;;  %v4837_v19 = vsub.f32 %v2151_v10, %v4819_v11 }
 0x3d2   :  { %v4849_v51 = vsub.f32 %v5068_v30, %v4829_v50 }
 0x3d3   :  { %v4842_v57 = vand.u32 4294901760, %v2150_v6  ;;  %v2399_v63 = vand.u32 4294901760, %v2398_v12  ;;  %v4845_v31 = vand.u32 4294901760, %v4837_v19  ;;  %v2293_v12 = vsub.f32 %v4840_v20, %v2292_v15 }
 0x3d4   :  { %v3919_v26 = vpop.eup %3918  ;;  %3641 = vmatpush3.xpose.msra.mxu0 %v4819_v11  ;;  %3675 = vmatpush3.xpose.msra.mxu1 %v2392_v3 }
 0x3d5   :  { %v2149_v23 = vmul.f32 %v3919_v26, %v4632_v0  ;;  %3642 = vmatprep.subr.mxu0 %v4842_v57  ;;  %3676 = vmatprep.subr.mxu1 %v2399_v63  ;;  %v2405_v2 = vsub.f32 %v4837_v19, %v4845_v31  ;;  %v4858_v62 = vsub.f32 %v2150_v6, %v4842_v57  ;;  %v2302_v6 = vand.u32 4294901760, %v4849_v51 }
 0x3d6   :  { %v2283_v0 = vsub.f32 %v4826_v25, %v5056_v28 }
 0x3d7   :  { %v4861_v10 = vand.u32 4294901760, %v2149_v23  ;;  %v2406_v22 = vand.u32 4294901760, %v2405_v2  ;;  %v4864_v3 = vand.u32 4294901760, %v4858_v62  ;;  %v2303_v28 = vsub.f32 %v4849_v51, %v2302_v6 }
 0x3d8   :  { %3643 = vmatpush3.xpose.msra.mxu0 %v4842_v57  ;;  %3677 = vmatpush3.xpose.msra.mxu1 %v2399_v63  ;;  %v2284_v2 = vand.u32 4294901760, %v2283_v0  ;;  %v5070_v0 = vld [vmem:[#allocation11_spill] sm:$0xff] }
 0x3d9   :  { %5069 = vst [vmem:[#allocation13_spill] sm:$0xff] %v4864_v3  ;;  %3644 = vmatprep.subr.mxu0 %v4861_v10  ;;  %3678 = vmatprep.subr.mxu1 %v2406_v22  ;;  %v2412_v7 = vsub.f32 %v4858_v62, %v4864_v3  ;;  %v4874_v30 = vsub.f32 %v2149_v23, %v4861_v10  ;;  %v2294_v3 = vand.u32 4294901760, %v2293_v12 }
 0x3db   :  { %v2413_v63 = vand.u32 4294901760, %v2412_v7  ;;  %v4881_v26 = vand.u32 4294901760, %v4874_v30 }
 0x3dc   :  { %3645 = vmatpush3.xpose.msra.mxu0 %v4861_v10  ;;  %3679 = vmatpush3.xpose.msra.mxu1 %v2406_v22  ;;  %v2304_v22 = vand.u32 4294901760, %v2303_v28 }
 0x3dd   :  { %3680 = vmatprep.subr.mxu1 %v2413_v63  ;;  %3690 = vmatprep.subr.mxu0 %v4646_v49  ;;  %v2419_v23 = vsub.f32 %v4874_v30, %v4881_v26 }
 0x3df   :  { %3647 = vmatmul.mubr.f32.vlgmr.msra.gmra.mxu0 %v2284_v2  ;;  %v2420_v7 = vand.u32 4294901760, %v2419_v23 }
 0x3e0   :  { %3649 = vmatprep.mubr.f32.mxu0 %v2294_v3  ;;  %3681 = vmatpush3.xpose.msra.mxu1 %v2413_v63 }
 0x3e1   :  { %3691 = vmatpush3.xpose.msra.mxu0 %v4646_v49  ;;  %3682 = vmatprep.subr.mxu1 %v2420_v7  ;;  %v5071_v49 = vand.u32 4294901760, %v5070_v0 }
 0x3e2   :  { %3692 = vmatprep.subr.mxu0 %v4658_v56 }
 0x3e3   :  { %3650 = vmatmul.mubr.f32.gmra.mxu0 %v2304_v22 }
 0x3e4   :  { %3683 = vmatpush3.xpose.msra.mxu1 %v2420_v7  ;;  %3722 = vmatprep.mubr.f32.mxu0 %v5070_v0 }
 0x3e5   :  { %3693 = vmatpush3.xpose.msra.mxu0 %v4658_v56  ;;  %3728 = vmatprep.subr.mxu1 %v4639_v9  ;;  %v5072_v56 = vld [vmem:[#allocation10_spill] sm:$0xff] }
 0x3e6   :  { %3694 = vmatprep.subr.mxu0 %v4676_v16 }
 0x3e7   :  { %3685 = vmatmul.mubr.f32.vlgmr.msra.gmra.mxu1 %v4807_v52 }
 0x3e8   :  { %3687 = vmatprep.mubr.f32.mxu1 %v4817_v8  ;;  %3729 = vmatpush3.xpose.msra.mxu1 %v4639_v9 }
 0x3e9   :  { %3695 = vmatpush3.xpose.msra.mxu0 %v4676_v16  ;;  %3730 = vmatprep.subr.mxu1 %v4642_v44  ;;  %v5073_v16 = vand.u32 4294901760, %v4826_v25 }
 0x3ea   :  { %3696 = vmatprep.subr.mxu0 %v4692_v24 }
 0x3eb   :  { %3688 = vmatmul.mubr.f32.gmra.mxu1 %v4829_v50 }
 0x3ec   :  { %3731 = vmatpush3.xpose.msra.mxu1 %v4642_v44  ;;  %3760 = vmatprep.mubr.f32.mxu1 %v5071_v49 }
 0x3ed   :  { %3697 = vmatpush3.xpose.msra.mxu0 %v4692_v24  ;;  %3732 = vmatprep.subr.mxu1 %v4660_v39 }
 0x3ee   :  { %3698 = vmatprep.subr.mxu0 %v4705_v45 }
 0x3f0   :  { %3733 = vmatpush3.xpose.msra.mxu1 %v4660_v39 }
 0x3f1   :  { %3699 = vmatpush3.xpose.msra.mxu0 %v4705_v45  ;;  %3734 = vmatprep.subr.mxu1 %v4678_v13 }
 0x3f2   :  { %3700 = vmatprep.subr.mxu0 %v4718_v36 }
 0x3f4   :  { %3735 = vmatpush3.xpose.msra.mxu1 %v4678_v13 }
 0x3f5   :  { %3701 = vmatpush3.xpose.msra.mxu0 %v4718_v36  ;;  %3736 = vmatprep.subr.mxu1 %v4694_v55 }
 0x3f6   :  { %3702 = vmatprep.subr.mxu0 %v4731_v59 }
 0x3f8   :  { %3737 = vmatpush3.xpose.msra.mxu1 %v4694_v55 }
 0x3f9   :  { %3703 = vmatpush3.xpose.msra.mxu0 %v4731_v59  ;;  %3738 = vmatprep.subr.mxu1 %v4707_v37 }
 0x3fa   :  { %3704 = vmatprep.subr.mxu0 %v4744_v58 }
 0x3fc   :  { %3739 = vmatpush3.xpose.msra.mxu1 %v4707_v37 }
 0x3fd   :  { %3705 = vmatpush3.xpose.msra.mxu0 %v4744_v58  ;;  %3740 = vmatprep.subr.mxu1 %v4720_v4 }
 0x3fe   :  { %3706 = vmatprep.subr.mxu0 %v4757_v38 }
 0x400   :  { %3741 = vmatpush3.xpose.msra.mxu1 %v4720_v4 }
 0x401   :  { %3707 = vmatpush3.xpose.msra.mxu0 %v4757_v38  ;;  %3742 = vmatprep.subr.mxu1 %v4733_v17 }
 0x402   :  { %3708 = vmatprep.subr.mxu0 %v4770_v18 }
 0x404   :  { %3743 = vmatpush3.xpose.msra.mxu1 %v4733_v17 }
 0x405   :  { %3709 = vmatpush3.xpose.msra.mxu0 %v4770_v18  ;;  %3744 = vmatprep.subr.mxu1 %v4746_v33 }
 0x406   :  { %3710 = vmatprep.subr.mxu0 %v4783_v32 }
 0x408   :  { %3745 = vmatpush3.xpose.msra.mxu1 %v4746_v33 }
 0x409   :  { %3711 = vmatpush3.xpose.msra.mxu0 %v4783_v32  ;;  %3746 = vmatprep.subr.mxu1 %v4759_v61 }
 0x40a   :  { %3712 = vmatprep.subr.mxu0 %v4798_v41 }
 0x40c   :  { %3747 = vmatpush3.xpose.msra.mxu1 %v4759_v61 }
 0x40d   :  { %3713 = vmatpush3.xpose.msra.mxu0 %v4798_v41  ;;  %3748 = vmatprep.subr.mxu1 %v4772_v29 }
 0x40e   :  { %3714 = vmatprep.subr.mxu0 %v4815_v5 }
 0x410   :  { %3749 = vmatpush3.xpose.msra.mxu1 %v4772_v29 }
 0x411   :  { %3715 = vmatpush3.xpose.msra.mxu0 %v4815_v5  ;;  %3750 = vmatprep.subr.mxu1 %v4785_v53 }
 0x412   :  { %3716 = vmatprep.subr.mxu0 %v4837_v19 }
 0x414   :  { %3751 = vmatpush3.xpose.msra.mxu1 %v4785_v53 }
 0x415   :  { %3717 = vmatpush3.xpose.msra.mxu0 %v4837_v19  ;;  %3752 = vmatprep.subr.mxu1 %v4801_v42 }
 0x416   :  { %3718 = vmatprep.subr.mxu0 %v4858_v62 }
 0x418   :  { %3753 = vmatpush3.xpose.msra.mxu1 %v4801_v42 }
 0x419   :  { %3719 = vmatpush3.xpose.msra.mxu0 %v4858_v62  ;;  %3754 = vmatprep.subr.mxu1 %v4819_v11 }
 0x41a   :  { %3720 = vmatprep.subr.mxu0 %v4874_v30 }
 0x41c   :  { %3755 = vmatpush3.xpose.msra.mxu1 %v4819_v11 }
 0x41d   :  { %3721 = vmatpush3.xpose.msra.mxu0 %v4874_v30  ;;  %3756 = vmatprep.subr.mxu1 %v4842_v57 }
 0x41e   :  { %3766 = vmatprep.subr.mxu0 %v4655_v46 }
 0x420   :  { %3723 = vmatmul.mubr.f32.vlgmr.msra.gmra.mxu0 %v4826_v25  ;;  %3757 = vmatpush3.xpose.msra.mxu1 %v4842_v57 }
 0x421   :  { %3725 = vmatprep.mubr.f32.mxu0 %v4840_v20  ;;  %3767 = vmatpush3.xpose.msra.mxu0 %v4655_v46 }
 0x422   :  { %3758 = vmatprep.subr.mxu1 %v4861_v10  ;;  %3768 = vmatprep.subr.mxu0 %v4665_v40 }
 0x424   :  { %3726 = vmatmul.mubr.f32.gmra.mxu0 %v4849_v51  ;;  %3759 = vmatpush3.xpose.msra.mxu1 %v4861_v10 }
 0x425   :  { %3769 = vmatpush3.xpose.msra.mxu0 %v4665_v40  ;;  %3798 = vmatprep.mubr.f32.mxu0 %v5072_v56 }
 0x426   :  { %3770 = vmatprep.subr.mxu0 %v4681_v21  ;;  %3804 = vmatprep.subr.mxu1 %v4639_v9 }
 0x427   :  { %3761 = vmatmul.mubr.f32.vlgmr.msra.gmra.mxu1 %v5073_v16 }
 0x428   :  { %3763 = vmatprep.mubr.f32.mxu1 %v2292_v15  ;;  %3805 = vmatpush3.xpose.msra.mxu1 %v4639_v9  ;;  %v5074_v9 = vld [vmem:[#allocation13_spill] sm:$0xff] }
 0x429   :  { %3771 = vmatpush3.xpose.msra.mxu0 %v4681_v21  ;;  %3806 = vmatprep.subr.mxu1 %v4642_v44 }
 0x42a   :  { %3772 = vmatprep.subr.mxu0 %v4697_v60 }
 0x42b   :  { %3764 = vmatmul.mubr.f32.gmra.mxu1 %v2302_v6 }
 0x42c   :  { %3807 = vmatpush3.xpose.msra.mxu1 %v4642_v44  ;;  %3836 = vmatprep.mubr.f32.mxu1 %v5072_v56 }
 0x42d   :  { %3773 = vmatpush3.xpose.msra.mxu0 %v4697_v60  ;;  %3808 = vmatprep.subr.mxu1 %v4660_v39 }
 0x42e   :  { %3774 = vmatprep.subr.mxu0 %v4710_v35 }
 0x430   :  { %3809 = vmatpush3.xpose.msra.mxu1 %v4660_v39 }
 0x431   :  { %3775 = vmatpush3.xpose.msra.mxu0 %v4710_v35  ;;  %3810 = vmatprep.subr.mxu1 %v4678_v13 }
 0x432   :  { %3776 = vmatprep.subr.mxu0 %v4723_v54 }
 0x434   :  { %3811 = vmatpush3.xpose.msra.mxu1 %v4678_v13  ;;  %v2172_v13 = vpop.permute.xlu1 %2171 }
 0x435   :  { %3777 = vmatpush3.xpose.msra.mxu0 %v4723_v54  ;;  %3812 = vmatprep.subr.mxu1 %v4694_v55 }
 0x436   :  { %3778 = vmatprep.subr.mxu0 %v4736_v48 }
 0x438   :  { %3813 = vmatpush3.xpose.msra.mxu1 %v4694_v55  ;;  %v2177_v60 = vpop.permute.xlu1 %2176 }
 0x439   :  { %3779 = vmatpush3.xpose.msra.mxu0 %v4736_v48  ;;  %3814 = vmatprep.subr.mxu1 %v4707_v37 }
 0x43a   :  { %3780 = vmatprep.subr.mxu0 %v4749_v34 }
 0x43c   :  { %3815 = vmatpush3.xpose.msra.mxu1 %v4707_v37  ;;  %v2182_v36 = vpop.permute.xlu1 %2181 }
 0x43d   :  { %3781 = vmatpush3.xpose.msra.mxu0 %v4749_v34  ;;  %3816 = vmatprep.subr.mxu1 %v4720_v4 }
 0x43e   :  { %3782 = vmatprep.subr.mxu0 %v4762_v14 }
 0x440   :  { %3817 = vmatpush3.xpose.msra.mxu1 %v4720_v4  ;;  %v2187_v58 = vpop.permute.xlu1 %2186 }
 0x441   :  { %3783 = vmatpush3.xpose.msra.mxu0 %v4762_v14  ;;  %3818 = vmatprep.subr.mxu1 %v4733_v17 }
 0x442   :  { %3784 = vmatprep.subr.mxu0 %v4775_v1 }
 0x444   :  { %3819 = vmatpush3.xpose.msra.mxu1 %v4733_v17 }
 0x445   :  { %3785 = vmatpush3.xpose.msra.mxu0 %v4775_v1  ;;  %3820 = vmatprep.subr.mxu1 %v4746_v33 }
 0x446   :  { %3786 = vmatprep.subr.mxu0 %v4788_v27 }
 0x448   :  { %3821 = vmatpush3.xpose.msra.mxu1 %v4746_v33 }
 0x449   :  { %3787 = vmatpush3.xpose.msra.mxu0 %v4788_v27  ;;  %3822 = vmatprep.subr.mxu1 %v4759_v61 }
 0x44a   :  { %3788 = vmatprep.subr.mxu0 %v4804_v47 }
 0x44c   :  { %3823 = vmatpush3.xpose.msra.mxu1 %v4759_v61 }
 0x44d   :  { %3789 = vmatpush3.xpose.msra.mxu0 %v4804_v47  ;;  %3824 = vmatprep.subr.mxu1 %v4772_v29 }
 0x44e   :  { %3790 = vmatprep.subr.mxu0 %v4822_v43 }
 0x450   :  { %3825 = vmatpush3.xpose.msra.mxu1 %v4772_v29 }
 0x451   :  { %3791 = vmatpush3.xpose.msra.mxu0 %v4822_v43  ;;  %3826 = vmatprep.subr.mxu1 %v4785_v53 }
 0x452   :  { %3792 = vmatprep.subr.mxu0 %v4845_v31 }
 0x454   :  { %3827 = vmatpush3.xpose.msra.mxu1 %v4785_v53 }
 0x455   :  { %3793 = vmatpush3.xpose.msra.mxu0 %v4845_v31  ;;  %3828 = vmatprep.subr.mxu1 %v4801_v42 }
 0x456   :  { %3794 = vmatprep.subr.mxu0 %v5074_v9 }
 0x458   :  { %3829 = vmatpush3.xpose.msra.mxu1 %v4801_v42 }
 0x459   :  { %3795 = vmatpush3.xpose.msra.mxu0 %v5074_v9  ;;  %3830 = vmatprep.subr.mxu1 %v4819_v11 }
 0x45a   :  { %3796 = vmatprep.subr.mxu0 %v4881_v26 }
 0x45c   :  { %3831 = vmatpush3.xpose.msra.mxu1 %v4819_v11 }
 0x45d   :  { %3797 = vmatpush3.xpose.msra.mxu0 %v4881_v26  ;;  %3832 = vmatprep.subr.mxu1 %v4842_v57 }
 0x460   :  { %3799 = vmatmul.mubr.f32.vlgmr.msra.gmra.mxu0 %v4807_v52  ;;  %3833 = vmatpush3.xpose.msra.mxu1 %v4842_v57 }
 0x461   :  { %3801 = vmatprep.mubr.f32.mxu0 %v4817_v8  ;;  %3834 = vmatprep.subr.mxu1 %v4861_v10 }
 0x464   :  { %3802 = vmatmul.mubr.f32.gmra.mxu0 %v4829_v50  ;;  %3835 = vmatpush3.xpose.msra.mxu1 %v4861_v10 }
 0x467   :  { %3837 = vmatmul.mubr.f32.vlgmr.msra.gmra.mxu1 %v4807_v52 }
 0x468   :  { %3839 = vmatprep.mubr.f32.mxu1 %v4817_v8 }
 0x46b   :  { %3840 = vmatmul.mubr.f32.gmra.mxu1 %v4829_v50 }
 0x49f   :  { %v3648_v44 = vpop.f32.mrf.mxu0 }
 0x4a0   :  { %v2287_v17 = vadd.f32 %v3648_v44, %v2177_v60 }
 0x4a1   :  { %v2276_v46 = vpop.f32.mrf.mxu0 }
 0x4a2   :  { %v2277_v33 = vadd.f32 %v2276_v46, %v2172_v13 }
 0x4a3   :  { %v3651_v40 = vpop.f32.mrf.mxu0 }
 0x4a4   :  { %v2307_v14 = vadd.f32 %v3651_v40, %v2187_v58 }
 0x4a5   :  { %v2296_v24 = vpop.f32.mrf.mxu0 }
 0x4a6   :  { %v2297_v32 = vadd.f32 %v2296_v24, %v2182_v36 }
 0x4a7   :  { %v3686_v39 = vpop.f32.mrf.mxu1 }
 0x4a8   :  { %v2464_v34 = vadd.f32 %v3686_v39, %v2287_v17 }
 0x4a9   :  { %v2457_v21 = vpop.f32.mrf.mxu1 }
 0x4aa   :  { %v2458_v18 = vadd.f32 %v2457_v21, %v2277_v33 }
 0x4ab   :  { %v3689_v45 = vpop.f32.mrf.mxu1 }
 0x4ac   :  { %v2476_v53 = vadd.f32 %v3689_v45, %v2307_v14 }
 0x4ad   :  { %v2469_v35 = vpop.f32.mrf.mxu1 }
 0x4ae   :  { %v2470_v52 = vadd.f32 %v2469_v35, %v2297_v32 }
 0x4e0   :  { %v3724_v55 = vpop.f32.mrf.mxu0 }
 0x4e1   :  { %v2587_v29 = vadd.f32 %v3724_v55, %v2464_v34 }
 0x4e2   :  { %v2579_v37 = vpop.f32.mrf.mxu0 }
 0x4e3   :  { %v2580_v27 = vadd.f32 %v2579_v37, %v2458_v18 }
 0x4e4   :  { %v3727_v54 = vpop.f32.mrf.mxu0 }
 0x4e5   :  { %v2601_v5 = vadd.f32 %v3727_v54, %v2476_v53 }
 0x4e6   :  { %v2593_v48 = vpop.f32.mrf.mxu0 }
 0x4e7   :  { %v3762_v4 = vpop.f32.mrf.mxu1  ;;  %v2594_v25 = vadd.f32 %v2593_v48, %v2470_v52 }
 0x4e8   :  { %v2698_v41 = vadd.f32 %v3762_v4, %v2587_v29 }
 0x4e9   :  { %v2689_v59 = vpop.f32.mrf.mxu1 }
 0x4ea   :  { %v2690_v8 = vadd.f32 %v2689_v59, %v2580_v27 }
 0x4eb   :  { %v3765_v61 = vpop.f32.mrf.mxu1 }
 0x4ec   :  { %v2714_v50 = vadd.f32 %v3765_v61, %v2601_v5 }
 0x4ed   :  { %v2705_v42 = vpop.f32.mrf.mxu1 }
 0x4ee   :  { %v2706_v51 = vadd.f32 %v2705_v42, %v2594_v25 }
 0x520   :  { %v3800_v38 = vpop.f32.mrf.mxu0 }
 0x521   :  { %v2839_v11 = vadd.f32 %v3800_v38, %v2698_v41 }
 0x522   :  { %v2832_v1 = vpop.f32.mrf.mxu0 }
 0x523   :  { %v2833_v19 = vadd.f32 %v2832_v1, %v2690_v8 }
 0x524   :  { %v3803_v47 = vpop.f32.mrf.mxu0 }
 0x525   :  { %v2851_v28 = vadd.f32 %v3803_v47, %v2714_v50 }
 0x526   :  { %v2844_v57 = vpop.f32.mrf.mxu0 }
 0x527   :  { %v3838_v43 = vpop.f32.mrf.mxu1  ;;  %v2845_v10 = vadd.f32 %v2844_v57, %v2706_v51 }
 0x528   :  { %v2944_v20 = vadd.f32 %v3838_v43, %v2839_v11 }
 0x529   :  { %v2937_v31 = vpop.f32.mrf.mxu1 }
 0x52a   :  { %2960 = vst [vmem:[#allocation5 + $0x8] sm:$0xff] %v2944_v20  ;;  %v2938_v62 = vadd.f32 %v2937_v31, %v2833_v19 }
 0x52b   :  { %v3841_v15 = vpop.f32.mrf.mxu1 }
 0x52c   :  { %2959 = vst [vmem:[#allocation5] sm:$0xff] %v2938_v62  ;;  %v2956_v3 = vadd.f32 %v3841_v15, %v2851_v28 }
 0x52d   :  { %v2949_v30 = vpop.f32.mrf.mxu1 }
 0x52e   :  { %2962 = vst [vmem:[#allocation5 + $0x18] sm:$0xff] %v2956_v3  ;;  %v2950_v6 = vadd.f32 %v2949_v30, %v2845_v10 }
 0x530   :  { %2961 = vst [vmem:[#allocation5 + $0x10] sm:$0xff] %v2950_v6 }
 0x531   :  { %3951 = shalt.err (!%p3948_p9)
}
 0x532   :  { %s3969_s15 = smov 128   ;;  %s3970_s16 = smov 8  }
 0x533   :  { %2974 = dma.vmem_to_hbm [thread:$0]  %s2969_s0, 512, %s5048_s5, [#allocation4], %s3969_s15, %s3969_s15, %s3970_s16  }
 0x534   :  { %3962 = dma.done.wait [#allocation4], 512  }
 0x535   :  { %3963 = vsyncadd [#allocation4], 4294966784 }
 0x536   :  { %2978 = vsyncpa [#allocation3], 1 }
 0x537   :  { %2979 = vsyncpa [#allocation4], 1 }

</bundles_post_ra>
